<compile_context>
chip_gen: v7x
topology: tpu7x:2x2x1
jax: 0.10.0
libtpu: 0.0.40
codegen_flags: <defaults>
</compile_context>

<pallas_src>
import functools

import numpy as np
import jax
import jax.numpy as jnp
from jax.experimental import pallas as pl
from jax.experimental.pallas import tpu as pltpu


# ----------------------------------------------------------------------------
# Host-side weight preparation: convs -> block-Toeplitz matrices, linear pairs
# fused, biases packed into one sublane-aligned slab.
# ----------------------------------------------------------------------------
def _conv_toeplitz(w, w_out, w_in, pad):
    """w: (Cout, Cin, K). out[wo*Co+co] = sum_{ci,k} in[(wo+k-pad)*Ci+ci] * w[co,ci,k]."""
    co, ci, kk = w.shape
    t = np.zeros((w_out * co, w_in * ci), np.float64)
    for wo in range(w_out):
        for k in range(kk):
            wi = wo + k - pad
            if 0 <= wi < w_in:
                t[wo * co:(wo + 1) * co, wi * ci:(wi + 1) * ci] += w[:, :, k]
    return t


def _convT_toeplitz(w, w_out, w_in, pad):
    """w: (Cin, Cout, K) (PyTorch ConvTranspose layout).
    out[wo*Co+co] = sum_{ci,k} in[(wo-k+pad)*Ci+ci] * w[ci,co,k]."""
    ci, co, kk = w.shape
    t = np.zeros((w_out * co, w_in * ci), np.float64)
    for wo in range(w_out):
        for k in range(kk):
            wi = wo - k + pad
            if 0 <= wi < w_in:
                t[wo * co:(wo + 1) * co, wi * ci:(wi + 1) * ci] += w[:, :, k].T
    return t


def _pad8(n):
    return -(-n // 8) * 8


def _bias_layout(W, Wc, L):
    """Bias segments: h1 (W*8), h2 (Wc*16), mu|lv (2L), g1 (W*8), g2 (W*3)."""
    rows = [W * 8, Wc * 16, 2 * L, W * 8, W * 3]
    offs, total = [], 0
    for r in rows:
        offs.append(total)
        total += _pad8(r)
    return rows, offs, total


def init_torch_params(key, latent_dim, W):
    """Deterministic synthetic parameters in PyTorch layout / convention."""
    Wc = W - 4
    flat = 16 * Wc
    PL2 = 2 * latent_dim
    ks = jax.random.split(key, 16)
    rnd = lambda k, s: 0.1 * jax.random.normal(k, s, dtype=jnp.float32)
    return dict(
        conv1_w=rnd(ks[0], (8, 3, 1, 3)), conv1_b=rnd(ks[1], (8,)),
        conv2_w=rnd(ks[2], (16, 8, 1, 5)), conv2_b=rnd(ks[3], (16,)),
        enc_w=rnd(ks[4], (PL2, flat)), enc_b=rnd(ks[5], (PL2,)),
        mu_w=rnd(ks[6], (latent_dim, PL2)), mu_b=rnd(ks[7], (latent_dim,)),
        lv_w=rnd(ks[8], (latent_dim, PL2)), lv_b=rnd(ks[9], (latent_dim,)),
        dec_w=rnd(ks[10], (flat, latent_dim)), dec_b=rnd(ks[11], (flat,)),
        dct1_w=rnd(ks[12], (16, 8, 1, 5)), dct1_b=rnd(ks[13], (8,)),
        dct2_w=rnd(ks[14], (8, 3, 1, 3)), dct2_b=rnd(ks[15], (3,)),
    )


def prepare_kernel_params(tp, W, L):
    """PyTorch-layout params -> lane-dense, pre-fused kernel slabs.

    Feature-row orderings (batch is on the lane axis everywhere):
      x   : w*3  + c     h1/g1 : w*8 + c     h2 : w*16 + c
      rec : w*3  + c     mu|lv : 2L (mu rows first)
    """
    Wc = W - 4
    f64 = lambda a: np.asarray(a, dtype=np.float64)

    c1 = f64(tp["conv1_w"])[:, :, 0, :]              # (8, 3, 3)
    c2 = f64(tp["conv2_w"])[:, :, 0, :]              # (16, 8, 5)
    d1 = f64(tp["dct1_w"])[:, :, 0, :]               # (16, 8, 5)  (Cin, Cout, K)
    d2 = f64(tp["dct2_w"])[:, :, 0, :]               # (8, 3, 3)

    T1 = _conv_toeplitz(c1, W, W, pad=1)             # (W*8,   W*3)
    T2 = _conv_toeplitz(c2, Wc, W, pad=0)            # (Wc*16, W*8)
    Td1 = _convT_toeplitz(d1, W, Wc, pad=0)          # (W*8,   Wc*16)
    Td2 = _convT_toeplitz(d2, W, W, pad=1)           # (W*3,   W*8)

    # Encoder Linear: PyTorch flatten index = c*Wc + w  ->  kernel row w*16 + c.
    Wenc = f64(tp["enc_w"]).reshape(2 * L, 16, Wc).transpose(0, 2, 1).reshape(2 * L, Wc * 16)
    benc = f64(tp["enc_b"])
    # Fused (mu | log_var) head folded into the encoder Linear (no nonlinearity
    # between them in the module):  mlv = Wml @ (Wenc h2 + benc) + bml.
    Wml_raw = np.concatenate([f64(tp["mu_w"]), f64(tp["lv_w"])], 0)      # (2L, 2L)
    bml_raw = np.concatenate([f64(tp["mu_b"]), f64(tp["lv_b"])])
    Wml = Wml_raw @ Wenc                                                 # (2L, Wc*16)
    bml = Wml_raw @ benc + bml_raw                                       # (2L,)

    # Decoder Linear folded into the first ConvTranspose (no nonlinearity
    # between them):  g1_pre = Td1 @ (Wdec lat + bdec) + bd1.
    Wdec_r = f64(tp["dec_w"]).reshape(16, Wc, L).transpose(1, 0, 2).reshape(Wc * 16, L)
    bdec_r = f64(tp["dec_b"]).reshape(16, Wc).T.reshape(Wc * 16)
    Wdec = Td1 @ Wdec_r                                                  # (W*8, L)
    bdec = Td1 @ bdec_r + np.tile(f64(tp["dct1_b"]), W)                  # (W*8,)

    b1 = np.tile(f64(tp["conv1_b"]), W)                                  # (W*8,)
    b2 = np.tile(f64(tp["conv2_b"]), Wc)                                 # (Wc*16,)
    bd2 = np.tile(f64(tp["dct2_b"]), W)                                  # (W*3,)

    rows, offs, total = _bias_layout(W, Wc, L)
    bias = np.zeros((total, 1), np.float64)
    for o, r, seg in zip(offs, rows, [b1, b2, bml, bdec, bd2]):
        bias[o:o + r, 0] = seg

    asf32 = lambda a: jnp.asarray(np.asarray(a, dtype=np.float32))
    return dict(
        T1=asf32(T1), T2=asf32(T2), Wml=asf32(Wml), Wdec=asf32(Wdec),
        Td2=asf32(Td2), bias=asf32(bias),
    )


# ----------------------------------------------------------------------------
# Kernel: one grid step = B samples, batch on the lane axis.  5 MXU matmuls.
# ----------------------------------------------------------------------------
def _make_kernel(W, Wc, L):
    f32 = jnp.float32
    rows, offs, _ = _bias_layout(W, Wc, L)

    def kernel(x_ref, eps_ref, t1_ref, t2_ref, wml_ref, wdec_ref, td2_ref,
               bias_ref, lat_ref, rec_ref, mlv_ref):
        def bias(i):
            # (rows_i, 1) slice, sublane-aligned start; broadcasts over lanes.
            return bias_ref[offs[i]:offs[i] + rows[i], :]

        x = x_ref[...]                                                          # (W*3,  B)
        # Encoder: Conv(3->8,k3,p1)+ReLU, Conv(8->16,k5)+ReLU.
        h1 = jnp.maximum(jnp.dot(t1_ref[...], x, preferred_element_type=f32)
                         + bias(0), 0.0)                                        # (W*8,  B)
        h2 = jnp.maximum(jnp.dot(t2_ref[...], h1, preferred_element_type=f32)
                         + bias(1), 0.0)                                        # (Wc*16,B)
        # Flatten + Linear fused with the (mu | log_var) heads.
        mlv = jnp.dot(wml_ref[...], h2, preferred_element_type=f32) + bias(2)   # (2L,   B)
        mu = mlv[:L, :]
        lv = mlv[L:, :]
        # Reparameterize (eps supplied from the host).
        lat = mu + eps_ref[...] * jnp.exp(0.5 * lv)                             # (L,    B)
        # Decoder: Linear+Unflatten fused with ConvT(16->8,k5), then ReLU,
        # ConvT(8->3,k3,p1), Sigmoid.
        g1 = jnp.maximum(jnp.dot(wdec_ref[...], lat, preferred_element_type=f32)
                         + bias(3), 0.0)                                        # (W*8,  B)
        g2 = jnp.dot(td2_ref[...], g1, preferred_element_type=f32) + bias(4)    # (W*3,  B)

        lat_ref[...] = lat
        mlv_ref[...] = mlv
        rec_ref[...] = jax.nn.sigmoid(g2)

    return kernel


@functools.partial(jax.jit, static_argnames=("latent_dim", "block_b"))
def cvae_forward(x_nchw, eps, kp, latent_dim, block_b=256):
    """x_nchw: (N, 3, 1, W) f32; eps: (N, L) f32.
    Returns (latent (N,L), reconstruction (N,3,1,W), mu (N,L), log_var (N,L))."""
    N, C, H, W = x_nchw.shape
    assert C == 3 and H == 1
    Wc = W - 4
    L = latent_dim

    # NCHW -> lane-batched slabs: rows = w*3 + c, lanes = sample index.
    x_bl = jnp.transpose(x_nchw[:, :, 0, :], (0, 2, 1)).reshape(N, W * 3).T    # (W*3, N)
    eps_bl = eps.T                                                             # (L,   N)

    nb = -(-N // block_b)
    Npad = nb * block_b
    if Npad != N:
        x_bl = jnp.pad(x_bl, ((0, 0), (0, Npad - N)))
        eps_bl = jnp.pad(eps_bl, ((0, 0), (0, Npad - N)))

    kernel = _make_kernel(W, Wc, L)
    full = lambda a: pl.BlockSpec(a.shape, lambda i: (0,) * a.ndim)
    in_specs = [
        pl.BlockSpec((W * 3, block_b), lambda i: (0, i)),       # x
        pl.BlockSpec((L, block_b), lambda i: (0, i)),           # eps
        full(kp["T1"]), full(kp["T2"]), full(kp["Wml"]),
        full(kp["Wdec"]), full(kp["Td2"]), full(kp["bias"]),
    ]
    out_specs = [
        pl.BlockSpec((L, block_b), lambda i: (0, i)),           # latent
        pl.BlockSpec((W * 3, block_b), lambda i: (0, i)),       # reconstruction
        pl.BlockSpec((2 * L, block_b), lambda i: (0, i)),       # mu | log_var
    ]
    out_shape = (
        jax.ShapeDtypeStruct((L, Npad), jnp.float32),
        jax.ShapeDtypeStruct((W * 3, Npad), jnp.float32),
        jax.ShapeDtypeStruct((2 * L, Npad), jnp.float32),
    )

    lat, rec, mlv = pl.pallas_call(
        kernel,
        out_shape=out_shape,
        grid_spec=pltpu.PrefetchScalarGridSpec(
            num_scalar_prefetch=0,
            grid=(nb,),
            in_specs=in_specs,
            out_specs=out_specs,
        ),
        compiler_params=pltpu.CompilerParams(
            dimension_semantics=("parallel",)),
    )(x_bl, eps_bl, kp["T1"], kp["T2"], kp["Wml"], kp["Wdec"], kp["Td2"],
      kp["bias"])

    latent = lat[:, :N].T
    mu = mlv[:L, :N].T
    log_var = mlv[L:, :N].T
    # rows = w*3 + c  ->  (N, W, 3) -> NCHW (N, 3, 1, W)
    reconstruction = jnp.transpose(rec[:, :N].T.reshape(N, W, 3), (0, 2, 1)).reshape(N, 3, 1, W)
    return latent, reconstruction, mu, log_var


# ----------------------------------------------------------------------------
# Pure-JAX reference mirroring the PyTorch module (raw weight layouts, no
# fusion, highest-precision matmuls).
# ----------------------------------------------------------------------------
def jax_reference(x_nchw, eps, tp, W, L):
    HP = jax.lax.Precision.HIGHEST
    N = x_nchw.shape[0]
    Wc = W - 4
    xw = x_nchw[:, :, 0, :]                                    # (N, 3, W)
    xp = jnp.pad(xw, ((0, 0), (0, 0), (1, 1)))                 # (N, 3, W+2)
    h1 = sum(jnp.einsum("ncw,oc->now", xp[:, :, k:k + W],
                        tp["conv1_w"][:, :, 0, k], precision=HP) for k in range(3))
    h1 = jnp.maximum(h1 + tp["conv1_b"][None, :, None], 0.0)
    h2 = sum(jnp.einsum("ncw,oc->now", h1[:, :, k:k + Wc],
                        tp["conv2_w"][:, :, 0, k], precision=HP) for k in range(5))
    h2 = jnp.maximum(h2 + tp["conv2_b"][None, :, None], 0.0)
    flat = h2.reshape(N, 16 * Wc)                              # torch Flatten: c*Wc + w
    enc = jnp.dot(flat, tp["enc_w"].T, precision=HP) + tp["enc_b"]
    mu = jnp.dot(enc, tp["mu_w"].T, precision=HP) + tp["mu_b"]
    lv = jnp.dot(enc, tp["lv_w"].T, precision=HP) + tp["lv_b"]
    lat = mu + eps * jnp.exp(0.5 * lv)
    d = (jnp.dot(lat, tp["dec_w"].T, precision=HP) + tp["dec_b"]).reshape(N, 16, Wc)
    dpad = jnp.pad(d, ((0, 0), (0, 0), (4, 4)))
    g1 = sum(jnp.einsum("ncw,co->now", dpad[:, :, 4 - k:4 - k + W],
                        tp["dct1_w"][:, :, 0, k], precision=HP) for k in range(5))
    g1 = jnp.maximum(g1 + tp["dct1_b"][None, :, None], 0.0)
    gpad = jnp.pad(g1, ((0, 0), (0, 0), (1, 1)))
    g2 = sum(jnp.einsum("ncw,co->now", gpad[:, :, 2 - k:2 - k + W],
                        tp["dct2_w"][:, :, 0, k], precision=HP) for k in range(3))
    g2 = g2 + tp["dct2_b"][None, :, None]
    rec = jax.nn.sigmoid(g2).reshape(N, 3, 1, W)
    return lat, rec, mu, lv


if __name__ == "__main__":
    latent_dim = 8
    W = 16            # image_shape = (16, 1): flattened_size = 16*1*(16-4) = 192
    N = 2

    key = jax.random.PRNGKey(0)
    k_x, k_eps, k_p = jax.random.split(key, 3)
    x = jax.random.uniform(k_x, (N, 3, 1, W), dtype=jnp.float32)
    eps = jax.random.normal(k_eps, (N, latent_dim), dtype=jnp.float32)
    torch_params = init_torch_params(k_p, latent_dim, W)
    kparams = prepare_kernel_params(torch_params, W, latent_dim)

    latent, recon, mu, log_var = jax.block_until_ready(
        cvae_forward(x, eps, kparams, latent_dim=latent_dim))

    # Validate against the pure-JAX reference (highest-precision matmuls).
    # Tolerance covers host-side weight fusion rounding and any reduced
    # precision MXU passes at the kernel's default matmul precision.
    r_lat, r_rec, r_mu, r_lv = jax_reference(x, eps, torch_params, W, latent_dim)
    assert latent.shape == (N, latent_dim)
    assert recon.shape == (N, 3, 1, W)
    assert mu.shape == (N, latent_dim) and log_var.shape == (N, latent_dim)
    tol = dict(atol=2e-3, rtol=2e-3)
    np.testing.assert_allclose(np.asarray(latent), np.asarray(r_lat), **tol)
    np.testing.assert_allclose(np.asarray(recon), np.asarray(r_rec), **tol)
    np.testing.assert_allclose(np.asarray(mu), np.asarray(r_mu), **tol)
    np.testing.assert_allclose(np.asarray(log_var), np.asarray(r_lv), **tol)

    print("KERNEL_OK")
</pallas_src>

<mosaic_0001>
module attributes {stable_mosaic.version = 11 : i64} {
  func.func @kernel(%arg0: i32, %arg1: memref<48x256xf32, #tpu.memory_space<vmem>>, %arg2: memref<8x256xf32, #tpu.memory_space<vmem>>, %arg3: memref<128x48xf32, #tpu.memory_space<vmem>>, %arg4: memref<192x128xf32, #tpu.memory_space<vmem>>, %arg5: memref<16x192xf32, #tpu.memory_space<vmem>>, %arg6: memref<128x8xf32, #tpu.memory_space<vmem>>, %arg7: memref<48x128xf32, #tpu.memory_space<vmem>>, %arg8: memref<512x1xf32, #tpu.memory_space<vmem>>, %arg9: memref<8x256xf32, #tpu.memory_space<vmem>>, %arg10: memref<48x256xf32, #tpu.memory_space<vmem>>, %arg11: memref<16x256xf32, #tpu.memory_space<vmem>>) attributes {dimension_semantics = [#tpu.dimension_semantics<parallel>], iteration_bounds = array<i64: 1>, scalar_prefetch = 0 : i64, scratch_operands = 0 : i64, tpu.core_type = #tpu.core_type<tc>, window_params = [{transform_indices = @transform_0, window_bounds = array<i64: 48, 256>}, {transform_indices = @transform_1, window_bounds = array<i64: 8, 256>}, {pipeline_mode = #tpu.pipeline_mode<synchronous>, transform_indices = @transform_2, window_bounds = array<i64: 128, 48>}, {pipeline_mode = #tpu.pipeline_mode<synchronous>, transform_indices = @transform_3, window_bounds = array<i64: 192, 128>}, {pipeline_mode = #tpu.pipeline_mode<synchronous>, transform_indices = @transform_4, window_bounds = array<i64: 16, 192>}, {pipeline_mode = #tpu.pipeline_mode<synchronous>, transform_indices = @transform_5, window_bounds = array<i64: 128, 8>}, {pipeline_mode = #tpu.pipeline_mode<synchronous>, transform_indices = @transform_6, window_bounds = array<i64: 48, 128>}, {pipeline_mode = #tpu.pipeline_mode<synchronous>, transform_indices = @transform_7, window_bounds = array<i64: 512, 1>}, {transform_indices = @transform_8, window_bounds = array<i64: 8, 256>}, {transform_indices = @transform_9, window_bounds = array<i64: 48, 256>}, {transform_indices = @transform_10, window_bounds = array<i64: 16, 256>}]} {
    %c0 = arith.constant 0 : index
    %c0_0 = arith.constant 0 : index
    %0 = vector.load %arg1[%c0, %c0_0] : memref<48x256xf32, #tpu.memory_space<vmem>>, vector<48x256xf32>
    %c0_1 = arith.constant 0 : index
    %c0_2 = arith.constant 0 : index
    %1 = vector.load %arg3[%c0_1, %c0_2] : memref<128x48xf32, #tpu.memory_space<vmem>>, vector<128x48xf32>
    %cst = arith.constant dense<0.000000e+00> : vector<128x256xf32>
    %2 = tpu.matmul %1, %0, %cst {dimension_numbers = #tpu.dot_dimension_numbers<[1], [0], [0], [1], [0, 0, 1, 1], [], []>} : vector<128x48xf32>, vector<48x256xf32>, vector<128x256xf32> -> vector<128x256xf32>
    %c0_3 = arith.constant 0 : index
    %c0_4 = arith.constant 0 : index
    %3 = vector.load %arg8[%c0_3, %c0_4] : memref<512x1xf32, #tpu.memory_space<vmem>>, vector<128x1xf32>
    %4 = vector.broadcast %3 : vector<128x1xf32> to vector<128x256xf32>
    %5 = arith.addf %2, %4 : vector<128x256xf32>
    %cst_5 = arith.constant 0.000000e+00 : f32
    %6 = vector.broadcast %cst_5 : f32 to vector<128x256xf32>
    %7 = arith.maximumf %5, %6 : vector<128x256xf32>
    %c0_6 = arith.constant 0 : index
    %c0_7 = arith.constant 0 : index
    %8 = vector.load %arg4[%c0_6, %c0_7] : memref<192x128xf32, #tpu.memory_space<vmem>>, vector<192x128xf32>
    %cst_8 = arith.constant dense<0.000000e+00> : vector<192x256xf32>
    %9 = tpu.matmul %8, %7, %cst_8 {dimension_numbers = #tpu.dot_dimension_numbers<[1], [0], [0], [1], [0, 0, 1, 1], [], []>} : vector<192x128xf32>, vector<128x256xf32>, vector<192x256xf32> -> vector<192x256xf32>
    %c128 = arith.constant 128 : index
    %c0_9 = arith.constant 0 : index
    %10 = vector.load %arg8[%c128, %c0_9] : memref<512x1xf32, #tpu.memory_space<vmem>>, vector<192x1xf32>
    %11 = vector.broadcast %10 : vector<192x1xf32> to vector<192x256xf32>
    %12 = arith.addf %9, %11 : vector<192x256xf32>
    %cst_10 = arith.constant 0.000000e+00 : f32
    %13 = vector.broadcast %cst_10 : f32 to vector<192x256xf32>
    %14 = arith.maximumf %12, %13 : vector<192x256xf32>
    %c0_11 = arith.constant 0 : index
    %c0_12 = arith.constant 0 : index
    %15 = vector.load %arg5[%c0_11, %c0_12] : memref<16x192xf32, #tpu.memory_space<vmem>>, vector<16x192xf32>
    %cst_13 = arith.constant dense<0.000000e+00> : vector<16x256xf32>
    %16 = tpu.matmul %15, %14, %cst_13 {dimension_numbers = #tpu.dot_dimension_numbers<[1], [0], [0], [1], [0, 0, 1, 1], [], []>} : vector<16x192xf32>, vector<192x256xf32>, vector<16x256xf32> -> vector<16x256xf32>
    %c320 = arith.constant 320 : index
    %c0_14 = arith.constant 0 : index
    %17 = vector.load %arg8[%c320, %c0_14] : memref<512x1xf32, #tpu.memory_space<vmem>>, vector<16x1xf32>
    %18 = vector.broadcast %17 : vector<16x1xf32> to vector<16x256xf32>
    %19 = arith.addf %16, %18 : vector<16x256xf32>
    %20 = vector.extract_strided_slice %19 {offsets = [0, 0], sizes = [8, 256], strides = [1, 1]} : vector<16x256xf32> to vector<8x256xf32>
    %21 = vector.extract_strided_slice %19 {offsets = [8, 0], sizes = [8, 256], strides = [1, 1]} : vector<16x256xf32> to vector<8x256xf32>
    %c0_15 = arith.constant 0 : index
    %c0_16 = arith.constant 0 : index
    %22 = vector.load %arg2[%c0_15, %c0_16] : memref<8x256xf32, #tpu.memory_space<vmem>>, vector<8x256xf32>
    %cst_17 = arith.constant 5.000000e-01 : f32
    %23 = vector.broadcast %cst_17 : f32 to vector<8x256xf32>
    %24 = arith.mulf %23, %21 : vector<8x256xf32>
    %25 = math.exp %24 : vector<8x256xf32>
    %26 = arith.mulf %22, %25 : vector<8x256xf32>
    %27 = arith.addf %20, %26 : vector<8x256xf32>
    %c0_18 = arith.constant 0 : index
    %c0_19 = arith.constant 0 : index
    %28 = vector.load %arg6[%c0_18, %c0_19] : memref<128x8xf32, #tpu.memory_space<vmem>>, vector<128x8xf32>
    %cst_20 = arith.constant dense<0.000000e+00> : vector<128x256xf32>
    %29 = tpu.matmul %28, %27, %cst_20 {dimension_numbers = #tpu.dot_dimension_numbers<[1], [0], [0], [1], [0, 0, 1, 1], [], []>} : vector<128x8xf32>, vector<8x256xf32>, vector<128x256xf32> -> vector<128x256xf32>
    %c336 = arith.constant 336 : index
    %c0_21 = arith.constant 0 : index
    %30 = vector.load %arg8[%c336, %c0_21] : memref<512x1xf32, #tpu.memory_space<vmem>>, vector<128x1xf32>
    %31 = vector.broadcast %30 : vector<128x1xf32> to vector<128x256xf32>
    %32 = arith.addf %29, %31 : vector<128x256xf32>
    %cst_22 = arith.constant 0.000000e+00 : f32
    %33 = vector.broadcast %cst_22 : f32 to vector<128x256xf32>
    %34 = arith.maximumf %32, %33 : vector<128x256xf32>
    %c0_23 = arith.constant 0 : index
    %c0_24 = arith.constant 0 : index
    %35 = vector.load %arg7[%c0_23, %c0_24] : memref<48x128xf32, #tpu.memory_space<vmem>>, vector<48x128xf32>
    %cst_25 = arith.constant dense<0.000000e+00> : vector<48x256xf32>
    %36 = tpu.matmul %35, %34, %cst_25 {dimension_numbers = #tpu.dot_dimension_numbers<[1], [0], [0], [1], [0, 0, 1, 1], [], []>} : vector<48x128xf32>, vector<128x256xf32>, vector<48x256xf32> -> vector<48x256xf32>
    %c464 = arith.constant 464 : index
    %c0_26 = arith.constant 0 : index
    %37 = vector.load %arg8[%c464, %c0_26] : memref<512x1xf32, #tpu.memory_space<vmem>>, vector<48x1xf32>
    %38 = vector.broadcast %37 : vector<48x1xf32> to vector<48x256xf32>
    %39 = arith.addf %36, %38 : vector<48x256xf32>
    %c0_27 = arith.constant 0 : index
    %c0_28 = arith.constant 0 : index
    %40 = vector.load %arg9[%c0_27, %c0_28] : memref<8x256xf32, #tpu.memory_space<vmem>>, vector<8x256xf32>
    tpu.vector_store %arg9[%c0_27, %c0_28], %27 {strides = array<i32>} : memref<8x256xf32, #tpu.memory_space<vmem>>, vector<8x256xf32>,
    %c0_29 = arith.constant 0 : index
    %c0_30 = arith.constant 0 : index
    %41 = vector.load %arg11[%c0_29, %c0_30] : memref<16x256xf32, #tpu.memory_space<vmem>>, vector<16x256xf32>
    tpu.vector_store %arg11[%c0_29, %c0_30], %19 {strides = array<i32>} : memref<16x256xf32, #tpu.memory_space<vmem>>, vector<16x256xf32>,
    %42 = arith.negf %39 : vector<48x256xf32>
    %43 = math.exp %42 : vector<48x256xf32>
    %cst_31 = arith.constant 1.000000e+00 : f32
    %44 = vector.broadcast %cst_31 : f32 to vector<48x256xf32>
    %45 = arith.addf %44, %43 : vector<48x256xf32>
    %46 = arith.divf %44, %45 : vector<48x256xf32>
    %c0_32 = arith.constant 0 : index
    %c0_33 = arith.constant 0 : index
    %47 = vector.load %arg10[%c0_32, %c0_33] : memref<48x256xf32, #tpu.memory_space<vmem>>, vector<48x256xf32>
    tpu.vector_store %arg10[%c0_32, %c0_33], %46 {strides = array<i32>} : memref<48x256xf32, #tpu.memory_space<vmem>>, vector<48x256xf32>,
    return
  }
  func.func @transform_0(%arg0: i32) -> (i32, i32) {
    %c0_i32 = arith.constant 0 : i32
    %c0_i32_0 = arith.constant 0 : i32
    return %c0_i32, %arg0 : i32, i32
  }
  func.func @transform_1(%arg0: i32) -> (i32, i32) {
    %c0_i32 = arith.constant 0 : i32
    %c0_i32_0 = arith.constant 0 : i32
    return %c0_i32, %arg0 : i32, i32
  }
  func.func @transform_2(%arg0: i32) -> (i32, i32) {
    %c0_i32 = arith.constant 0 : i32
    %c0_i32_0 = arith.constant 0 : i32
    %c0_i32_1 = arith.constant 0 : i32
    return %c0_i32, %c0_i32_0 : i32, i32
  }
  func.func @transform_3(%arg0: i32) -> (i32, i32) {
    %c0_i32 = arith.constant 0 : i32
    %c0_i32_0 = arith.constant 0 : i32
    %c0_i32_1 = arith.constant 0 : i32
    return %c0_i32, %c0_i32_0 : i32, i32
  }
  func.func @transform_4(%arg0: i32) -> (i32, i32) {
    %c0_i32 = arith.constant 0 : i32
    %c0_i32_0 = arith.constant 0 : i32
    %c0_i32_1 = arith.constant 0 : i32
    return %c0_i32, %c0_i32_0 : i32, i32
  }
  func.func @transform_5(%arg0: i32) -> (i32, i32) {
    %c0_i32 = arith.constant 0 : i32
    %c0_i32_0 = arith.constant 0 : i32
    %c0_i32_1 = arith.constant 0 : i32
    return %c0_i32, %c0_i32_0 : i32, i32
  }
  func.func @transform_6(%arg0: i32) -> (i32, i32) {
    %c0_i32 = arith.constant 0 : i32
    %c0_i32_0 = arith.constant 0 : i32
    %c0_i32_1 = arith.constant 0 : i32
    return %c0_i32, %c0_i32_0 : i32, i32
  }
  func.func @transform_7(%arg0: i32) -> (i32, i32) {
    %c0_i32 = arith.constant 0 : i32
    %c0_i32_0 = arith.constant 0 : i32
    %c0_i32_1 = arith.constant 0 : i32
    return %c0_i32, %c0_i32_0 : i32, i32
  }
  func.func @transform_8(%arg0: i32) -> (i32, i32) {
    %c0_i32 = arith.constant 0 : i32
    %c0_i32_0 = arith.constant 0 : i32
    return %c0_i32, %arg0 : i32, i32
  }
  func.func @transform_9(%arg0: i32) -> (i32, i32) {
    %c0_i32 = arith.constant 0 : i32
    %c0_i32_0 = arith.constant 0 : i32
    return %c0_i32, %arg0 : i32, i32
  }
  func.func @transform_10(%arg0: i32) -> (i32, i32) {
    %c0_i32 = arith.constant 0 : i32
    %c0_i32_0 = arith.constant 0 : i32
    return %c0_i32, %arg0 : i32, i32
  }
}

</mosaic_0001>

<bundles_post_ra>
// kernel: cvae_forward.1
= control target key start
LH: loop header
LB: loop body
LE: loop exit
PB: predicated region body
PF: predicated region fallthrough
CT: control target
= control target key end

     0   :  { %v1760_v0 = vmov 0   ;;  %v1761_v8 = vmov 0.0   ;;  %vm156_vm0 = vcmask 392192   ;;  %vm839_vm1 = vcmask 523264   ;;  %s2399_s0 = inlined_call_operand.vmem [shape: f32[48,256], index: 0, kind: input, shape index: {}]   ;;  %s2400_s7 = inlined_call_operand.vmem [shape: f32[512,1], index: 7, kind: input, shape index: {}]   ;;  %s2401_s2 = inlined_call_operand.vmem [shape: f32[128,48], index: 2, kind: input, shape index: {}]   ;;  %s2402_s3 = inlined_call_operand.vmem [shape: f32[192,128], index: 3, kind: input, shape index: {}]   ;;  %s2403_s4 = inlined_call_operand.vmem [shape: f32[16,192], index: 4, kind: input, shape index: {}]   ;;  %s2404_s10 = inlined_call_operand.vmem [shape: f32[16,256], index: 10, kind: output, shape index: {2}]   ;;  %s2405_s1 = inlined_call_operand.vmem [shape: f32[8,256], index: 1, kind: input, shape index: {}]   ;;  %s2406_s8 = inlined_call_operand.vmem [shape: f32[8,256], index: 8, kind: output, shape index: {0}]   ;;  %s2407_s5 = inlined_call_operand.vmem [shape: f32[128,8], index: 5, kind: input, shape index: {}]   ;;  %s2408_s6 = inlined_call_operand.vmem [shape: f32[48,128], index: 6, kind: input, shape index: {}]   ;;  %s2409_s9 = inlined_call_operand.vmem [shape: f32[48,256], index: 9, kind: output, shape index: {1}]  }
   0x1   :  { %1706 = vset.pattern.permute.xlu0 %v1760_v0  ;;  %v33_v1 = vld [vmem:[%s2399_s0 + $0x8] sm:$0xff]  ;;  %v35_v2 = vld [vmem:[%s2399_s0 + $0x18] sm:$0xff]  ;;  %v60_v3 = vld [vmem:[%s2400_s7] sm:$0xff]  ;;  %1707 = vset.pattern.permute.xlu1 %v1760_v0  ;;  %vm1047_vm2 = vcmask 64512  }
   0x2   :  { %v1580_v4 = vpack.c.bf16 %v35_v2, %v33_v1  ;;  %78 = vperm.xlu0 %1706, %v60_v3   ;;  %v32_v5 = vld [vmem:[%s2399_s0] sm:$0xff]  ;;  %v34_v6 = vld [vmem:[%s2399_s0 + $0x10] sm:$0xff]  ;;  %v37_v7 = vld [vmem:[%s2399_s0 + $0x28] sm:$0xff]  ;;  %269 = vmatprep.mubr.f32.mxu0 %v1761_v8 }
   0x3   :  { %v1582_v9 = vpack.c.bf16 %v34_v6, %v32_v5  ;;  %v39_v10 = vld [vmem:[%s2399_s0 + $0x38] sm:$0xff]  ;;  %v62_v11 = vld [vmem:[%s2400_s7 + $0x10] sm:$0xff]  ;;  %v61_v12 = vld [vmem:[%s2400_s7 + $0x8] sm:$0xff]  ;;  %630 = vmatprep.mubr.f32.mxu1 %v1761_v8 }
   0x4   :  { %1581 = vmatprep.subr.bf16.mxu0 %v1580_v4  ;;  %v1584_v13 = vpack.c.bf16 %v39_v10, %v37_v7  ;;  %88 = vperm.xlu1 %1707, %v62_v11   ;;  %v36_v14 = vld [vmem:[%s2399_s0 + $0x20] sm:$0xff]  ;;  %v38_v15 = vld [vmem:[%s2399_s0 + $0x30] sm:$0xff]  ;;  %v41_v16 = vld [vmem:[%s2399_s0 + $0x48] sm:$0xff] }
   0x5   :  { %1583 = vmatpush1.bf16.msra.mxu0 %v1582_v9  ;;  %v1586_v17 = vpack.c.bf16 %v38_v15, %v36_v14  ;;  %v43_v18 = vld [vmem:[%s2399_s0 + $0x58] sm:$0xff]  ;;  %v40_v21 = vld [vmem:[%s2399_s0 + $0x40] sm:$0xff]  ;;  %v42_v22 = vld [vmem:[%s2399_s0 + $0x50] sm:$0xff] }
   0x6   :  { %v63_v19 = vld [vmem:[%s2400_s7 + $0x18] sm:$0xff]  ;;  %1585 = vmatprep.subr.bf16.mxu0 %v1584_v13  ;;  %83 = vperm.xlu0 %1706, %v61_v12   ;;  %v1588_v20 = vpack.c.bf16 %v43_v18, %v41_v16  ;;  %v64_v23 = vld [vmem:[%s2400_s7 + $0x20] sm:$0xff]  ;;  %v1590_v24 = vpack.c.bf16 %v42_v22, %v40_v21  ;;  %v65_v25 = vld [vmem:[%s2400_s7 + $0x28] sm:$0xff] }
   0x7   :  { %v66_v26 = vld [vmem:[%s2400_s7 + $0x30] sm:$0xff]  ;;  %v44_v27 = vld [vmem:[%s2401_s2] sm:$0xff]  ;;  %v67_v28 = vld [vmem:[%s2400_s7 + $0x38] sm:$0xff] }
   0x8   :  { %93 = vperm.xlu1 %1707, %v63_v19   ;;  %v68_v29 = vld [vmem:[%s2400_s7 + $0x40] sm:$0xff]  ;;  %v45_v30 = vld [vmem:[%s2401_s2 + $0x8] sm:$0xff]  ;;  %v70_v32 = vld [vmem:[%s2400_s7 + $0x50] sm:$0xff] }
   0x9   :  { %1587 = vmatpush1.bf16.msra.mxu0 %v1586_v17  ;;  %v69_v31 = vld [vmem:[%s2400_s7 + $0x48] sm:$0xff]  ;;  %v46_v33 = vld [vmem:[%s2401_s2 + $0x10] sm:$0xff]  ;;  %v71_v34 = vld [vmem:[%s2400_s7 + $0x58] sm:$0xff] }
   0xa   :  { %1589 = vmatprep.subr.bf16.mxu0 %v1588_v20  ;;  %98 = vperm.xlu0 %1706, %v64_v23   ;;  %v72_v35 = vld [vmem:[%s2400_s7 + $0x60] sm:$0xff]  ;;  %v47_v36 = vld [vmem:[%s2401_s2 + $0x18] sm:$0xff]  ;;  %v73_v37 = vld [vmem:[%s2400_s7 + $0x68] sm:$0xff] }
   0xb   :  { %v74_v38 = vld [vmem:[%s2400_s7 + $0x70] sm:$0xff]  ;;  %v48_v39 = vld [vmem:[%s2401_s2 + $0x20] sm:$0xff]  ;;  %v75_v40 = vld [vmem:[%s2400_s7 + $0x78] sm:$0xff] }
   0xc   :  { %103 = vperm.xlu1 %1707, %v65_v25   ;;  %v422_v41 = vld [vmem:[%s2400_s7 + $0x80] sm:$0xff]  ;;  %v49_v42 = vld [vmem:[%s2401_s2 + $0x28] sm:$0xff]  ;;  %v424_v44 = vld [vmem:[%s2400_s7 + $0x90] sm:$0xff] }
   0xd   :  { %1591 = vmatpush1.bf16.msra.mxu0 %v1590_v24  ;;  %v423_v43 = vld [vmem:[%s2400_s7 + $0x88] sm:$0xff]  ;;  %v50_v45 = vld [vmem:[%s2401_s2 + $0x30] sm:$0xff]  ;;  %v425_v46 = vld [vmem:[%s2400_s7 + $0x98] sm:$0xff] }
   0xe   :  { %108 = vperm.xlu0 %1706, %v66_v26   ;;  %v426_v47 = vld [vmem:[%s2400_s7 + $0xa0] sm:$0xff]  ;;  %v51_v48 = vld [vmem:[%s2401_s2 + $0x38] sm:$0xff]  ;;  %v427_v49 = vld [vmem:[%s2400_s7 + $0xa8] sm:$0xff] }
   0xf   :  { %v428_v50 = vld [vmem:[%s2400_s7 + $0xb0] sm:$0xff]  ;;  %v52_v51 = vld [vmem:[%s2401_s2 + $0x40] sm:$0xff]  ;;  %v429_v52 = vld [vmem:[%s2400_s7 + $0xb8] sm:$0xff] }
  0x10   :  { %1534 = vmatmul.mubr.msk.f32.vlgmr.msra.gmra.mrb[0].mxu0 %vm156_vm0, %v44_v27  ;;  %113 = vperm.xlu1 %1707, %v67_v28   ;;  %v430_v53 = vld [vmem:[%s2400_s7 + $0xc0] sm:$0xff]  ;;  %v53_v54 = vld [vmem:[%s2401_s2 + $0x48] sm:$0xff]  ;;  %v432_v56 = vld [vmem:[%s2400_s7 + $0xd0] sm:$0xff] }
  0x11   :  { %275 = vmatprep.mubr.f32.mxu0 %v1761_v8  ;;  %v431_v55 = vld [vmem:[%s2400_s7 + $0xc8] sm:$0xff]  ;;  %v54_v57 = vld [vmem:[%s2401_s2 + $0x50] sm:$0xff]  ;;  %v433_v58 = vld [vmem:[%s2400_s7 + $0xd8] sm:$0xff] }
  0x12   :  { %118 = vperm.xlu0 %1706, %v68_v29   ;;  %v434_v59 = vld [vmem:[%s2400_s7 + $0xe0] sm:$0xff]  ;;  %v55_v60 = vld [vmem:[%s2401_s2 + $0x58] sm:$0xff]  ;;  %v435_v61 = vld [vmem:[%s2400_s7 + $0xe8] sm:$0xff] }
  0x13   :  { %v436_v62 = vld [vmem:[%s2400_s7 + $0xf0] sm:$0xff]  ;;  %v56_v63 = vld [vmem:[%s2401_s2 + $0x60] sm:$0xff]  ;;  %v437_v0 = vld [vmem:[%s2400_s7 + $0xf8] sm:$0xff] }
  0x14   :  { %1535 = vmatmul.mubr.msk.f32.gmra.mrb[2].mxu0 %vm156_vm0, %v45_v30  ;;  %123 = vperm.xlu1 %1707, %v69_v31   ;;  %v438_v1 = vld [vmem:[%s2400_s7 + $0x100] sm:$0xff]  ;;  %v57_v2 = vld [vmem:[%s2401_s2 + $0x68] sm:$0xff]  ;;  %v440_v4 = vld [vmem:[%s2400_s7 + $0x110] sm:$0xff] }
  0x15   :  { %281 = vmatprep.mubr.f32.mxu0 %v1761_v8  ;;  %v439_v3 = vld [vmem:[%s2400_s7 + $0x108] sm:$0xff]  ;;  %v58_v5 = vld [vmem:[%s2401_s2 + $0x70] sm:$0xff]  ;;  %v441_v6 = vld [vmem:[%s2400_s7 + $0x118] sm:$0xff] }
  0x16   :  { %128 = vperm.xlu0 %1706, %v70_v32   ;;  %v442_v7 = vld [vmem:[%s2400_s7 + $0x120] sm:$0xff]  ;;  %v59_v9 = vld [vmem:[%s2401_s2 + $0x78] sm:$0xff]  ;;  %v443_v10 = vld [vmem:[%s2400_s7 + $0x128] sm:$0xff] }
  0x17   :  { %v444_v11 = vld [vmem:[%s2400_s7 + $0x130] sm:$0xff]  ;;  %v445_v12 = vld [vmem:[%s2400_s7 + $0x138] sm:$0xff]  ;;  %v828_v13 = vld [vmem:[%s2400_s7 + $0x148] sm:$0xff] }
  0x18   :  { %1536 = vmatmul.mubr.msk.f32.gmra.mrb[4].mxu0 %vm156_vm0, %v46_v33  ;;  %133 = vperm.xlu1 %1707, %v71_v34   ;;  %v827_v14 = vld [vmem:[%s2400_s7 + $0x140] sm:$0xff]  ;;  %v951_v15 = vld [vmem:[%s2400_s7 + $0x150] sm:$0xff]  ;;  %v952_v16 = vld [vmem:[%s2400_s7 + $0x158] sm:$0xff] }
  0x19   :  { %287 = vmatprep.mubr.f32.mxu0 %v1761_v8  ;;  %v953_v17 = vld [vmem:[%s2400_s7 + $0x160] sm:$0xff]  ;;  %v954_v18 = vld [vmem:[%s2400_s7 + $0x168] sm:$0xff]  ;;  %v955_v19 = vld [vmem:[%s2400_s7 + $0x170] sm:$0xff] }
  0x1a   :  { %138 = vperm.xlu0 %1706, %v72_v35   ;;  %v956_v20 = vld [vmem:[%s2400_s7 + $0x178] sm:$0xff]  ;;  %v957_v21 = vld [vmem:[%s2400_s7 + $0x180] sm:$0xff]  ;;  %v958_v22 = vld [vmem:[%s2400_s7 + $0x188] sm:$0xff] }
  0x1b   :  { %v959_v23 = vld [vmem:[%s2400_s7 + $0x190] sm:$0xff]  ;;  %v960_v24 = vld [vmem:[%s2400_s7 + $0x198] sm:$0xff]  ;;  %v961_v25 = vld [vmem:[%s2400_s7 + $0x1a0] sm:$0xff] }
  0x1c   :  { %1537 = vmatmul.mubr.msk.f32.gmra.mrb[6].mxu0 %vm156_vm0, %v47_v36  ;;  %143 = vperm.xlu1 %1707, %v73_v37   ;;  %v962_v26 = vld [vmem:[%s2400_s7 + $0x1a8] sm:$0xff]  ;;  %v963_v27 = vld [vmem:[%s2400_s7 + $0x1b0] sm:$0xff]  ;;  %v964_v28 = vld [vmem:[%s2400_s7 + $0x1b8] sm:$0xff] }
  0x1d   :  { %293 = vmatprep.mubr.f32.mxu0 %v1761_v8  ;;  %v965_v29 = vld [vmem:[%s2400_s7 + $0x1c0] sm:$0xff]  ;;  %v966_v30 = vld [vmem:[%s2400_s7 + $0x1c8] sm:$0xff]  ;;  %v1295_v31 = vld [vmem:[%s2400_s7 + $0x1d0] sm:$0xff] }
  0x1e   :  { %148 = vperm.xlu0 %1706, %v74_v38   ;;  %v1296_v32 = vld [vmem:[%s2400_s7 + $0x1d8] sm:$0xff]  ;;  %v1297_v33 = vld [vmem:[%s2400_s7 + $0x1e0] sm:$0xff]  ;;  %v1298_v34 = vld [vmem:[%s2400_s7 + $0x1e8] sm:$0xff] }
  0x1f   :  { %v1299_v35 = vld [vmem:[%s2400_s7 + $0x1f0] sm:$0xff]  ;;  %v1300_v36 = vld [vmem:[%s2400_s7 + $0x1f8] sm:$0xff] }
  0x20   :  { %1538 = vmatmul.mubr.msk.f32.gmra.mrb[8].mxu0 %vm156_vm0, %v48_v39  ;;  %153 = vperm.xlu1 %1707, %v75_v40  }
  0x21   :  { %299 = vmatprep.mubr.f32.mxu0 %v1761_v8 }
  0x22   :  { %448 = vperm.xlu0 %1706, %v422_v41  }
  0x24   :  { %1539 = vmatmul.mubr.msk.f32.gmra.mrb[10].mxu0 %vm156_vm0, %v49_v42  ;;  %453 = vperm.xlu1 %1707, %v423_v43  }
  0x25   :  { %305 = vmatprep.mubr.f32.mxu0 %v1761_v8 }
  0x26   :  { %458 = vperm.xlu0 %1706, %v424_v44  }
  0x28   :  { %1540 = vmatmul.mubr.msk.f32.gmra.mrb[12].mxu0 %vm156_vm0, %v50_v45  ;;  %463 = vperm.xlu1 %1707, %v425_v46  }
  0x29   :  { %311 = vmatprep.mubr.f32.mxu0 %v1761_v8 }
  0x2a   :  { %468 = vperm.xlu0 %1706, %v426_v47  }
  0x2c   :  { %1541 = vmatmul.mubr.msk.f32.gmra.mrb[14].mxu0 %vm156_vm0, %v51_v48  ;;  %473 = vperm.xlu1 %1707, %v427_v49  }
  0x2d   :  { %317 = vmatprep.mubr.f32.mxu0 %v1761_v8 }
  0x2e   :  { %478 = vperm.xlu0 %1706, %v428_v50  }
  0x30   :  { %1542 = vmatmul.mubr.msk.f32.gmra.mrb[16].mxu0 %vm156_vm0, %v52_v51  ;;  %483 = vperm.xlu1 %1707, %v429_v52  }
  0x31   :  { %323 = vmatprep.mubr.f32.mxu0 %v1761_v8 }
  0x32   :  { %488 = vperm.xlu0 %1706, %v430_v53  }
  0x34   :  { %1543 = vmatmul.mubr.msk.f32.gmra.mrb[18].mxu0 %vm156_vm0, %v53_v54  ;;  %493 = vperm.xlu1 %1707, %v431_v55  }
  0x35   :  { %329 = vmatprep.mubr.f32.mxu0 %v1761_v8 }
  0x36   :  { %498 = vperm.xlu0 %1706, %v432_v56  }
  0x38   :  { %1544 = vmatmul.mubr.msk.f32.gmra.mrb[20].mxu0 %vm156_vm0, %v54_v57  ;;  %503 = vperm.xlu1 %1707, %v433_v58  }
  0x39   :  { %335 = vmatprep.mubr.f32.mxu0 %v1761_v8 }
  0x3a   :  { %508 = vperm.xlu0 %1706, %v434_v59  }
  0x3c   :  { %1545 = vmatmul.mubr.msk.f32.gmra.mrb[22].mxu0 %vm156_vm0, %v55_v60  ;;  %513 = vperm.xlu1 %1707, %v435_v61  }
  0x3d   :  { %341 = vmatprep.mubr.f32.mxu0 %v1761_v8 }
  0x3e   :  { %518 = vperm.xlu0 %1706, %v436_v62  }
  0x40   :  { %1546 = vmatmul.mubr.msk.f32.gmra.mrb[24].mxu0 %vm156_vm0, %v56_v63  ;;  %523 = vperm.xlu1 %1707, %v437_v0  }
  0x41   :  { %347 = vmatprep.mubr.f32.mxu0 %v1761_v8 }
  0x42   :  { %528 = vperm.xlu0 %1706, %v438_v1  }
  0x44   :  { %1547 = vmatmul.mubr.msk.f32.gmra.mrb[26].mxu0 %vm156_vm0, %v57_v2  ;;  %533 = vperm.xlu1 %1707, %v439_v3  }
  0x45   :  { %353 = vmatprep.mubr.f32.mxu0 %v1761_v8 }
  0x46   :  { %538 = vperm.xlu0 %1706, %v440_v4  }
  0x48   :  { %1548 = vmatmul.mubr.msk.f32.gmra.mrb[28].mxu0 %vm156_vm0, %v58_v5  ;;  %543 = vperm.xlu1 %1707, %v441_v6  }
  0x49   :  { %359 = vmatprep.mubr.f32.mxu0 %v1761_v8 }
  0x4a   :  { %548 = vperm.xlu0 %1706, %v442_v7  }
  0x4c   :  { %1549 = vmatmul.mubr.msk.f32.gmra.mrb[30].mxu0 %vm156_vm0, %v59_v9  ;;  %553 = vperm.xlu1 %1707, %v443_v10  }
  0x4e   :  { %558 = vperm.xlu0 %1706, %v444_v11  }
  0x50   :  { %563 = vperm.xlu1 %1707, %v445_v12  }
  0x52   :  { %836 = vperm.xlu0 %1706, %v828_v13  }
  0x54   :  { %831 = vperm.xlu1 %1707, %v827_v14  }
  0x56   :  { %969 = vperm.xlu0 %1706, %v951_v15  }
  0x58   :  { %974 = vperm.xlu1 %1707, %v952_v16  }
  0x5a   :  { %979 = vperm.xlu0 %1706, %v953_v17  }
  0x5c   :  { %984 = vperm.xlu1 %1707, %v954_v18  }
  0x5e   :  { %989 = vperm.xlu0 %1706, %v955_v19  }
  0x60   :  { %994 = vperm.xlu1 %1707, %v956_v20  }
  0x62   :  { %999 = vperm.xlu0 %1706, %v957_v21  }
  0x64   :  { %1004 = vperm.xlu1 %1707, %v958_v22  }
  0x66   :  { %1009 = vperm.xlu0 %1706, %v959_v23  }
  0x68   :  { %1014 = vperm.xlu1 %1707, %v960_v24  }
  0x6a   :  { %1019 = vperm.xlu0 %1706, %v961_v25  }
  0x6c   :  { %1024 = vperm.xlu1 %1707, %v962_v26  }
  0x6e   :  { %1029 = vperm.xlu0 %1706, %v963_v27  }
  0x70   :  { %1034 = vperm.xlu1 %1707, %v964_v28  }
  0x72   :  { %1039 = vperm.xlu0 %1706, %v965_v29  }
  0x74   :  { %1044 = vperm.xlu1 %1707, %v966_v30  }
  0x76   :  { %1303 = vperm.xlu0 %1706, %v1295_v31  }
  0x78   :  { %1308 = vperm.xlu1 %1707, %v1296_v32  }
  0x7a   :  { %1313 = vperm.xlu0 %1706, %v1297_v33  }
  0x7c   :  { %1318 = vperm.xlu1 %1707, %v1298_v34  }
  0x7e   :  { %1323 = vperm.xlu0 %1706, %v1299_v35  }
  0x80   :  { %1328 = vperm.xlu1 %1707, %v1300_v36  }
  0x81   :  { %v79_v37 = vpop.permute.xlu0 %78 }
  0x83   :  { %v89_v46 = vpop.permute.xlu1 %88 }
  0x85   :  { %v84_v41 = vpop.permute.xlu0 %83 }
  0x87   :  { %v94_v57 = vpop.permute.xlu1 %93 }
  0x89   :  { %v99_v6 = vpop.permute.xlu0 %98 }
  0x8b   :  { %v104_v10 = vpop.permute.xlu1 %103 }
  0x8d   :  { %v109_v23 = vpop.permute.xlu0 %108 }
  0x8f   :  { %v114_v26 = vpop.permute.xlu1 %113 }
  0xe3   :  { %v271_v38 = vpop.f32.mrb[0].mxu0 }
  0xe4   :  { %v273_v39 = vpop.f32.mrb[1].mxu0  ;;  %v272_v40 = vadd.f32 %v271_v38, %v79_v37 }
  0xe5   :  { %v274_v42 = vadd.f32 %v273_v39, %v79_v37  ;;  %v119_v39 = vpop.permute.xlu0 %118 }
  0xe6   :  { %v366_v48 = vmax.f32 %v272_v40, 0.0 }
  0xe7   :  { %v277_v43 = vpop.f32.mrb[2].mxu0  ;;  %v367_v50 = vmax.f32 %v274_v42, 0.0  ;;  %v124_v42 = vpop.permute.xlu1 %123 }
  0xe8   :  { %v278_v44 = vadd.f32 %v277_v43, %v84_v41  ;;  %v279_v45 = vpop.f32.mrb[3].mxu0 }
  0xe9   :  { %v280_v47 = vadd.f32 %v279_v45, %v84_v41 }
  0xea   :  { %v368_v49 = vmax.f32 %v278_v44, 0.0 }
  0xeb   :  { %v369_v51 = vmax.f32 %v280_v47, 0.0  ;;  %v283_v52 = vpop.f32.mrb[4].mxu0 }
  0xec   :  { %v285_v53 = vpop.f32.mrb[5].mxu0  ;;  %v1594_v54 = vpack.c.bf16 %v368_v49, %v366_v48  ;;  %v284_v56 = vadd.f32 %v283_v52, %v89_v46 }
  0xed   :  { %v1592_v55 = vpack.c.bf16 %v369_v51, %v367_v50  ;;  %v286_v58 = vadd.f32 %v285_v53, %v89_v46 }
  0xee   :  { %v370_v63 = vmax.f32 %v284_v56, 0.0 }
  0xef   :  { %v289_v59 = vpop.f32.mrb[6].mxu0  ;;  %1593 = vmatprep.subr.bf16.mxu1 %v1592_v55  ;;  %v371_v1 = vmax.f32 %v286_v58, 0.0  ;;  %v129_v55 = vpop.permute.xlu0 %128 }
  0xf0   :  { %v290_v60 = vadd.f32 %v289_v59, %v94_v57  ;;  %v291_v61 = vpop.f32.mrb[7].mxu0  ;;  %1595 = vmatpush1.bf16.msra.mxu1 %v1594_v54  ;;  %v134_v58 = vpop.permute.xlu1 %133 }
  0xf1   :  { %v292_v62 = vadd.f32 %v291_v61, %v94_v57 }
  0xf2   :  { %v372_v0 = vmax.f32 %v290_v60, 0.0 }
  0xf3   :  { %v373_v2 = vmax.f32 %v292_v62, 0.0  ;;  %v295_v3 = vpop.f32.mrb[8].mxu0 }
  0xf4   :  { %v1598_v4 = vpack.c.bf16 %v372_v0, %v370_v63  ;;  %v297_v5 = vpop.f32.mrb[9].mxu0  ;;  %v296_v9 = vadd.f32 %v295_v3, %v99_v6 }
  0xf5   :  { %v1596_v7 = vpack.c.bf16 %v373_v2, %v371_v1  ;;  %v298_v11 = vadd.f32 %v297_v5, %v99_v6 }
  0xf6   :  { %v374_v16 = vmax.f32 %v296_v9, 0.0 }
  0xf7   :  { %v301_v12 = vpop.f32.mrb[10].mxu0  ;;  %1597 = vmatprep.subr.bf16.mxu1 %v1596_v7  ;;  %v375_v18 = vmax.f32 %v298_v11, 0.0  ;;  %v139_v7 = vpop.permute.xlu0 %138 }
  0xf8   :  { %v302_v13 = vadd.f32 %v301_v12, %v104_v10  ;;  %v303_v14 = vpop.f32.mrb[11].mxu0  ;;  %1599 = vmatpush1.bf16.msra.mxu1 %v1598_v4  ;;  %v144_v11 = vpop.permute.xlu1 %143 }
  0xf9   :  { %v304_v15 = vadd.f32 %v303_v14, %v104_v10 }
  0xfa   :  { %v376_v17 = vmax.f32 %v302_v13, 0.0 }
  0xfb   :  { %v377_v19 = vmax.f32 %v304_v15, 0.0  ;;  %v307_v20 = vpop.f32.mrb[12].mxu0 }
  0xfc   :  { %v1602_v21 = vpack.c.bf16 %v376_v17, %v374_v16  ;;  %v309_v22 = vpop.f32.mrb[13].mxu0  ;;  %v308_v25 = vadd.f32 %v307_v20, %v109_v23 }
  0xfd   :  { %v1600_v24 = vpack.c.bf16 %v377_v19, %v375_v18  ;;  %v310_v27 = vadd.f32 %v309_v22, %v109_v23 }
  0xfe   :  { %v378_v32 = vmax.f32 %v308_v25, 0.0 }
  0xff   :  { %v313_v28 = vpop.f32.mrb[14].mxu0  ;;  %1601 = vmatprep.subr.bf16.mxu1 %v1600_v24  ;;  %v379_v34 = vmax.f32 %v310_v27, 0.0  ;;  %v149_v24 = vpop.permute.xlu0 %148 }
 0x100   :  { %v314_v29 = vadd.f32 %v313_v28, %v114_v26  ;;  %v315_v30 = vpop.f32.mrb[15].mxu0  ;;  %1603 = vmatpush1.bf16.msra.mxu1 %v1602_v21  ;;  %v154_v27 = vpop.permute.xlu1 %153 }
 0x101   :  { %v316_v31 = vadd.f32 %v315_v30, %v114_v26 }
 0x102   :  { %v380_v33 = vmax.f32 %v314_v29, 0.0 }
 0x103   :  { %v381_v35 = vmax.f32 %v316_v31, 0.0  ;;  %v319_v36 = vpop.f32.mrb[16].mxu0 }
 0x104   :  { %v1606_v37 = vpack.c.bf16 %v380_v33, %v378_v32  ;;  %v321_v38 = vpop.f32.mrb[17].mxu0  ;;  %v320_v41 = vadd.f32 %v319_v36, %v119_v39 }
 0x105   :  { %v1604_v40 = vpack.c.bf16 %v381_v35, %v379_v34  ;;  %v322_v43 = vadd.f32 %v321_v38, %v119_v39  ;;  %v398_v39 = vld [vmem:[%s2402_s3] sm:$0xff] }
 0x106   :  { %v382_v48 = vmax.f32 %v320_v41, 0.0  ;;  %v400_v41 = vld [vmem:[%s2402_s3 + $0x10] sm:$0xff] }
 0x107   :  { %v325_v44 = vpop.f32.mrb[18].mxu0  ;;  %1605 = vmatprep.subr.bf16.mxu1 %v1604_v40  ;;  %v383_v50 = vmax.f32 %v322_v43, 0.0  ;;  %v399_v40 = vld [vmem:[%s2402_s3 + $0x8] sm:$0xff]  ;;  %v402_v43 = vld [vmem:[%s2402_s3 + $0x20] sm:$0xff] }
 0x108   :  { %v326_v45 = vadd.f32 %v325_v44, %v124_v42  ;;  %v327_v46 = vpop.f32.mrb[19].mxu0  ;;  %1607 = vmatpush1.bf16.msra.mxu1 %v1606_v37  ;;  %v403_v44 = vld [vmem:[%s2402_s3 + $0x28] sm:$0xff] }
 0x109   :  { %v328_v47 = vadd.f32 %v327_v46, %v124_v42  ;;  %v401_v42 = vld [vmem:[%s2402_s3 + $0x18] sm:$0xff] }
 0x10a   :  { %v384_v49 = vmax.f32 %v326_v45, 0.0  ;;  %v404_v45 = vld [vmem:[%s2402_s3 + $0x30] sm:$0xff]  ;;  %v405_v46 = vld [vmem:[%s2402_s3 + $0x38] sm:$0xff] }
 0x10b   :  { %v385_v51 = vmax.f32 %v328_v47, 0.0  ;;  %v331_v52 = vpop.f32.mrb[20].mxu0  ;;  %v406_v47 = vld [vmem:[%s2402_s3 + $0x40] sm:$0xff] }
 0x10c   :  { %v1610_v53 = vpack.c.bf16 %v384_v49, %v382_v48  ;;  %v333_v54 = vpop.f32.mrb[21].mxu0  ;;  %v332_v57 = vadd.f32 %v331_v52, %v129_v55  ;;  %v407_v48 = vld [vmem:[%s2402_s3 + $0x48] sm:$0xff]  ;;  %v408_v49 = vld [vmem:[%s2402_s3 + $0x50] sm:$0xff] }
 0x10d   :  { %v1608_v56 = vpack.c.bf16 %v385_v51, %v383_v50  ;;  %v334_v59 = vadd.f32 %v333_v54, %v129_v55  ;;  %v409_v50 = vld [vmem:[%s2402_s3 + $0x58] sm:$0xff]  ;;  %v410_v51 = vld [vmem:[%s2402_s3 + $0x60] sm:$0xff]  ;;  %v411_v52 = vld [vmem:[%s2402_s3 + $0x68] sm:$0xff] }
 0x10e   :  { %v386_v0 = vmax.f32 %v332_v57, 0.0  ;;  %v413_v54 = vld [vmem:[%s2402_s3 + $0x78] sm:$0xff]  ;;  %v414_v55 = vld [vmem:[%s2402_s3 + $0x80] sm:$0xff]  ;;  %v416_v57 = vld [vmem:[%s2402_s3 + $0x90] sm:$0xff] }
 0x10f   :  { %v337_v60 = vpop.f32.mrb[22].mxu0  ;;  %1609 = vmatprep.subr.bf16.mxu1 %v1608_v56  ;;  %v387_v2 = vmax.f32 %v334_v59, 0.0  ;;  %v415_v56 = vld [vmem:[%s2402_s3 + $0x88] sm:$0xff]  ;;  %v418_v59 = vld [vmem:[%s2402_s3 + $0xa0] sm:$0xff] }
 0x110   :  { %v338_v61 = vadd.f32 %v337_v60, %v134_v58  ;;  %v339_v62 = vpop.f32.mrb[23].mxu0  ;;  %1611 = vmatpush1.bf16.msra.mxu1 %v1610_v53  ;;  %v412_v53 = vld [vmem:[%s2402_s3 + $0x70] sm:$0xff]  ;;  %v419_v60 = vld [vmem:[%s2402_s3 + $0xa8] sm:$0xff] }
 0x111   :  { %v340_v63 = vadd.f32 %v339_v62, %v134_v58  ;;  %v417_v58 = vld [vmem:[%s2402_s3 + $0x98] sm:$0xff] }
 0x112   :  { %v388_v1 = vmax.f32 %v338_v61, 0.0  ;;  %v420_v61 = vld [vmem:[%s2402_s3 + $0xb0] sm:$0xff]  ;;  %v421_v62 = vld [vmem:[%s2402_s3 + $0xb8] sm:$0xff] }
 0x113   :  { %v389_v3 = vmax.f32 %v340_v63, 0.0  ;;  %v343_v4 = vpop.f32.mrb[24].mxu0  ;;  %v824_v63 = vld [vmem:[%s2403_s4 + $0x8] sm:$0xff] }
 0x114   :  { %v1614_v5 = vpack.c.bf16 %v388_v1, %v386_v0  ;;  %v345_v6 = vpop.f32.mrb[25].mxu0  ;;  %v344_v10 = vadd.f32 %v343_v4, %v139_v7  ;;  %1550 = vmatprep.mubr.msk.f32.mxu0 %vm839_vm1, %v824_v63  ;;  %v454_v4 = vpop.permute.xlu1 %453 }
 0x115   :  { %v1612_v9 = vpack.c.bf16 %v389_v3, %v387_v2  ;;  %v346_v12 = vadd.f32 %v345_v6, %v139_v7  ;;  %v449_v2 = vpop.permute.xlu0 %448 }
 0x116   :  { %v390_v17 = vmax.f32 %v344_v10, 0.0 }
 0x117   :  { %v349_v13 = vpop.f32.mrb[26].mxu0  ;;  %1613 = vmatprep.subr.bf16.mxu1 %v1612_v9  ;;  %v391_v19 = vmax.f32 %v346_v12, 0.0 }
 0x118   :  { %v350_v14 = vadd.f32 %v349_v13, %v144_v11  ;;  %v351_v15 = vpop.f32.mrb[27].mxu0  ;;  %1615 = vmatpush1.bf16.msra.mxu1 %v1614_v5 }
 0x119   :  { %v352_v16 = vadd.f32 %v351_v15, %v144_v11 }
 0x11a   :  { %v392_v18 = vmax.f32 %v350_v14, 0.0 }
 0x11b   :  { %v393_v20 = vmax.f32 %v352_v16, 0.0  ;;  %v355_v21 = vpop.f32.mrb[28].mxu0 }
 0x11c   :  { %v1618_v22 = vpack.c.bf16 %v392_v18, %v390_v17  ;;  %v357_v23 = vpop.f32.mrb[29].mxu0  ;;  %v356_v26 = vadd.f32 %v355_v21, %v149_v24  ;;  %v459_v18 = vpop.permute.xlu0 %458 }
 0x11d   :  { %v1616_v25 = vpack.c.bf16 %v393_v20, %v391_v19  ;;  %v358_v28 = vadd.f32 %v357_v23, %v149_v24  ;;  %v464_v21 = vpop.permute.xlu1 %463 }
 0x11e   :  { %v394_v33 = vmax.f32 %v356_v26, 0.0 }
 0x11f   :  { %v361_v29 = vpop.f32.mrb[30].mxu0  ;;  %1617 = vmatprep.subr.bf16.mxu1 %v1616_v25  ;;  %v395_v35 = vmax.f32 %v358_v28, 0.0 }
 0x120   :  { %v362_v30 = vadd.f32 %v361_v29, %v154_v27  ;;  %v363_v31 = vpop.f32.mrb[31].mxu0  ;;  %1619 = vmatpush1.bf16.msra.mxu1 %v1618_v22 }
 0x121   :  { %v364_v32 = vadd.f32 %v363_v31, %v154_v27 }
 0x122   :  { %v396_v34 = vmax.f32 %v362_v30, 0.0 }
 0x123   :  { %v397_v36 = vmax.f32 %v364_v32, 0.0 }
 0x124   :  { %v1622_v37 = vpack.c.bf16 %v396_v34, %v394_v33  ;;  %v469_v34 = vpop.permute.xlu0 %468 }
 0x125   :  { %v1620_v38 = vpack.c.bf16 %v397_v36, %v395_v35 }
 0x127   :  { %1621 = vmatprep.subr.bf16.mxu1 %v1620_v38 }
 0x128   :  { %1623 = vmatpush1.bf16.msra.mxu1 %v1622_v37  ;;  %v474_v37 = vpop.permute.xlu1 %473 }
 0x12b   :  { %631 = vmatmul.mubr.f32.vlgmr.msra.gmra.mrb[0].mxu1 %v398_v39 }
 0x12c   :  { %636 = vmatprep.mubr.f32.mxu1 %v1761_v8 }
 0x12f   :  { %637 = vmatmul.mubr.f32.gmra.mrb[2].mxu1 %v399_v40 }
 0x130   :  { %642 = vmatprep.mubr.f32.mxu1 %v1761_v8 }
 0x133   :  { %643 = vmatmul.mubr.f32.gmra.mrb[4].mxu1 %v400_v41 }
 0x134   :  { %648 = vmatprep.mubr.f32.mxu1 %v1761_v8 }
 0x137   :  { %649 = vmatmul.mubr.f32.gmra.mrb[6].mxu1 %v401_v42 }
 0x138   :  { %654 = vmatprep.mubr.f32.mxu1 %v1761_v8 }
 0x13b   :  { %655 = vmatmul.mubr.f32.gmra.mrb[8].mxu1 %v402_v43 }
 0x13c   :  { %660 = vmatprep.mubr.f32.mxu1 %v1761_v8 }
 0x13f   :  { %661 = vmatmul.mubr.f32.gmra.mrb[10].mxu1 %v403_v44 }
 0x140   :  { %666 = vmatprep.mubr.f32.mxu1 %v1761_v8 }
 0x143   :  { %667 = vmatmul.mubr.f32.gmra.mrb[12].mxu1 %v404_v45 }
 0x144   :  { %672 = vmatprep.mubr.f32.mxu1 %v1761_v8 }
 0x147   :  { %673 = vmatmul.mubr.f32.gmra.mrb[14].mxu1 %v405_v46 }
 0x148   :  { %678 = vmatprep.mubr.f32.mxu1 %v1761_v8 }
 0x14b   :  { %679 = vmatmul.mubr.f32.gmra.mrb[16].mxu1 %v406_v47 }
 0x14c   :  { %684 = vmatprep.mubr.f32.mxu1 %v1761_v8 }
 0x14f   :  { %685 = vmatmul.mubr.f32.gmra.mrb[18].mxu1 %v407_v48 }
 0x150   :  { %690 = vmatprep.mubr.f32.mxu1 %v1761_v8 }
 0x153   :  { %691 = vmatmul.mubr.f32.gmra.mrb[20].mxu1 %v408_v49 }
 0x154   :  { %696 = vmatprep.mubr.f32.mxu1 %v1761_v8 }
 0x157   :  { %697 = vmatmul.mubr.f32.gmra.mrb[22].mxu1 %v409_v50  ;;  %v479_v50 = vpop.permute.xlu0 %478 }
 0x158   :  { %702 = vmatprep.mubr.f32.mxu1 %v1761_v8 }
 0x15b   :  { %703 = vmatmul.mubr.f32.gmra.mrb[24].mxu1 %v410_v51 }
 0x15c   :  { %708 = vmatprep.mubr.f32.mxu1 %v1761_v8 }
 0x15f   :  { %709 = vmatmul.mubr.f32.gmra.mrb[26].mxu1 %v411_v52 }
 0x160   :  { %714 = vmatprep.mubr.f32.mxu1 %v1761_v8 }
 0x163   :  { %715 = vmatmul.mubr.f32.gmra.mrb[28].mxu1 %v412_v53  ;;  %v484_v53 = vpop.permute.xlu1 %483 }
 0x164   :  { %720 = vmatprep.mubr.f32.mxu1 %v1761_v8 }
 0x167   :  { %721 = vmatmul.mubr.f32.gmra.mrb[30].mxu1 %v413_v54 }
 0x168   :  { %726 = vmatprep.mubr.f32.mxu1 %v1761_v8 }
 0x16b   :  { %727 = vmatmul.mubr.f32.gmra.mrb[32].mxu1 %v414_v55 }
 0x16c   :  { %732 = vmatprep.mubr.f32.mxu1 %v1761_v8 }
 0x16f   :  { %733 = vmatmul.mubr.f32.gmra.mrb[34].mxu1 %v415_v56 }
 0x170   :  { %738 = vmatprep.mubr.f32.mxu1 %v1761_v8 }
 0x173   :  { %739 = vmatmul.mubr.f32.gmra.mrb[36].mxu1 %v416_v57 }
 0x174   :  { %744 = vmatprep.mubr.f32.mxu1 %v1761_v8 }
 0x177   :  { %745 = vmatmul.mubr.f32.gmra.mrb[38].mxu1 %v417_v58 }
 0x178   :  { %750 = vmatprep.mubr.f32.mxu1 %v1761_v8 }
 0x17b   :  { %751 = vmatmul.mubr.f32.gmra.mrb[40].mxu1 %v418_v59 }
 0x17c   :  { %756 = vmatprep.mubr.f32.mxu1 %v1761_v8 }
 0x17f   :  { %757 = vmatmul.mubr.f32.gmra.mrb[42].mxu1 %v419_v60 }
 0x180   :  { %762 = vmatprep.mubr.f32.mxu1 %v1761_v8 }
 0x183   :  { %763 = vmatmul.mubr.f32.gmra.mrb[44].mxu1 %v420_v61 }
 0x184   :  { %768 = vmatprep.mubr.f32.mxu1 %v1761_v8 }
 0x187   :  { %769 = vmatmul.mubr.f32.gmra.mrb[46].mxu1 %v421_v62 }
 0x188   :  { %1395 = vmatprep.mubr.f32.mxu1 %v1761_v8 }
 0x1fe   :  { %v632_v0 = vpop.f32.mrb[0].mxu1 }
 0x1ff   :  { %v634_v1 = vpop.f32.mrb[1].mxu1  ;;  %v633_v3 = vadd.f32 %v632_v0, %v449_v2 }
 0x200   :  { %v635_v5 = vadd.f32 %v634_v1, %v449_v2  ;;  %v489_v2 = vpop.permute.xlu0 %488 }
 0x201   :  { %v775_v11 = vmax.f32 %v633_v3, 0.0 }
 0x202   :  { %v638_v6 = vpop.f32.mrb[2].mxu1  ;;  %v776_v13 = vmax.f32 %v635_v5, 0.0  ;;  %v494_v5 = vpop.permute.xlu1 %493 }
 0x203   :  { %v639_v7 = vadd.f32 %v638_v6, %v454_v4  ;;  %v640_v9 = vpop.f32.mrb[3].mxu1 }
 0x204   :  { %v641_v10 = vadd.f32 %v640_v9, %v454_v4 }
 0x205   :  { %v777_v12 = vmax.f32 %v639_v7, 0.0 }
 0x206   :  { %v778_v14 = vmax.f32 %v641_v10, 0.0  ;;  %v644_v15 = vpop.f32.mrb[4].mxu1 }
 0x207   :  { %v1626_v16 = vpack.c.bf16 %v777_v12, %v775_v11  ;;  %v646_v17 = vpop.f32.mrb[5].mxu1  ;;  %v645_v20 = vadd.f32 %v644_v15, %v459_v18 }
 0x208   :  { %v1624_v19 = vpack.c.bf16 %v778_v14, %v776_v13  ;;  %v647_v22 = vadd.f32 %v646_v17, %v459_v18 }
 0x209   :  { %v779_v27 = vmax.f32 %v645_v20, 0.0 }
 0x20a   :  { %v650_v23 = vpop.f32.mrb[6].mxu1  ;;  %1625 = vmatprep.subr.bf16.mxu0 %v1624_v19  ;;  %v780_v29 = vmax.f32 %v647_v22, 0.0  ;;  %v499_v19 = vpop.permute.xlu0 %498 }
 0x20b   :  { %v651_v24 = vadd.f32 %v650_v23, %v464_v21  ;;  %v652_v25 = vpop.f32.mrb[7].mxu1  ;;  %1627 = vmatpush1.bf16.msra.mxu0 %v1626_v16  ;;  %v504_v22 = vpop.permute.xlu1 %503 }
 0x20c   :  { %v653_v26 = vadd.f32 %v652_v25, %v464_v21 }
 0x20d   :  { %v781_v28 = vmax.f32 %v651_v24, 0.0 }
 0x20e   :  { %v782_v30 = vmax.f32 %v653_v26, 0.0  ;;  %v656_v31 = vpop.f32.mrb[8].mxu1 }
 0x20f   :  { %v1630_v32 = vpack.c.bf16 %v781_v28, %v779_v27  ;;  %v658_v33 = vpop.f32.mrb[9].mxu1  ;;  %v657_v36 = vadd.f32 %v656_v31, %v469_v34 }
 0x210   :  { %v1628_v35 = vpack.c.bf16 %v782_v30, %v780_v29  ;;  %v659_v38 = vadd.f32 %v658_v33, %v469_v34 }
 0x211   :  { %v783_v43 = vmax.f32 %v657_v36, 0.0 }
 0x212   :  { %v662_v39 = vpop.f32.mrb[10].mxu1  ;;  %1629 = vmatprep.subr.bf16.mxu0 %v1628_v35  ;;  %v784_v45 = vmax.f32 %v659_v38, 0.0  ;;  %v509_v35 = vpop.permute.xlu0 %508 }
 0x213   :  { %v663_v40 = vadd.f32 %v662_v39, %v474_v37  ;;  %v664_v41 = vpop.f32.mrb[11].mxu1  ;;  %1631 = vmatpush1.bf16.msra.mxu0 %v1630_v32  ;;  %v514_v38 = vpop.permute.xlu1 %513 }
 0x214   :  { %v665_v42 = vadd.f32 %v664_v41, %v474_v37 }
 0x215   :  { %v785_v44 = vmax.f32 %v663_v40, 0.0 }
 0x216   :  { %v786_v46 = vmax.f32 %v665_v42, 0.0  ;;  %v668_v47 = vpop.f32.mrb[12].mxu1 }
 0x217   :  { %v1634_v48 = vpack.c.bf16 %v785_v44, %v783_v43  ;;  %v670_v49 = vpop.f32.mrb[13].mxu1  ;;  %v669_v52 = vadd.f32 %v668_v47, %v479_v50 }
 0x218   :  { %v1632_v51 = vpack.c.bf16 %v786_v46, %v784_v45  ;;  %v671_v54 = vadd.f32 %v670_v49, %v479_v50 }
 0x219   :  { %v787_v59 = vmax.f32 %v669_v52, 0.0 }
 0x21a   :  { %v674_v55 = vpop.f32.mrb[14].mxu1  ;;  %1633 = vmatprep.subr.bf16.mxu0 %v1632_v51  ;;  %v788_v61 = vmax.f32 %v671_v54, 0.0  ;;  %v519_v51 = vpop.permute.xlu0 %518 }
 0x21b   :  { %v675_v56 = vadd.f32 %v674_v55, %v484_v53  ;;  %v676_v57 = vpop.f32.mrb[15].mxu1  ;;  %1635 = vmatpush1.bf16.msra.mxu0 %v1634_v48  ;;  %v524_v54 = vpop.permute.xlu1 %523 }
 0x21c   :  { %v677_v58 = vadd.f32 %v676_v57, %v484_v53 }
 0x21d   :  { %v789_v60 = vmax.f32 %v675_v56, 0.0 }
 0x21e   :  { %v790_v62 = vmax.f32 %v677_v58, 0.0  ;;  %v680_v63 = vpop.f32.mrb[16].mxu1 }
 0x21f   :  { %v1638_v0 = vpack.c.bf16 %v789_v60, %v787_v59  ;;  %v682_v1 = vpop.f32.mrb[17].mxu1  ;;  %v681_v4 = vadd.f32 %v680_v63, %v489_v2 }
 0x220   :  { %v1636_v3 = vpack.c.bf16 %v790_v62, %v788_v61  ;;  %v683_v6 = vadd.f32 %v682_v1, %v489_v2 }
 0x221   :  { %v791_v12 = vmax.f32 %v681_v4, 0.0 }
 0x222   :  { %v686_v7 = vpop.f32.mrb[18].mxu1  ;;  %1637 = vmatprep.subr.bf16.mxu0 %v1636_v3  ;;  %v792_v14 = vmax.f32 %v683_v6, 0.0  ;;  %v529_v3 = vpop.permute.xlu0 %528 }
 0x223   :  { %v687_v9 = vadd.f32 %v686_v7, %v494_v5  ;;  %v688_v10 = vpop.f32.mrb[19].mxu1  ;;  %1639 = vmatpush1.bf16.msra.mxu0 %v1638_v0  ;;  %v534_v6 = vpop.permute.xlu1 %533 }
 0x224   :  { %v689_v11 = vadd.f32 %v688_v10, %v494_v5 }
 0x225   :  { %v793_v13 = vmax.f32 %v687_v9, 0.0 }
 0x226   :  { %v794_v15 = vmax.f32 %v689_v11, 0.0  ;;  %v692_v16 = vpop.f32.mrb[20].mxu1 }
 0x227   :  { %v1642_v17 = vpack.c.bf16 %v793_v13, %v791_v12  ;;  %v694_v18 = vpop.f32.mrb[21].mxu1  ;;  %v693_v21 = vadd.f32 %v692_v16, %v499_v19 }
 0x228   :  { %v1640_v20 = vpack.c.bf16 %v794_v15, %v792_v14  ;;  %v695_v23 = vadd.f32 %v694_v18, %v499_v19 }
 0x229   :  { %v795_v28 = vmax.f32 %v693_v21, 0.0 }
 0x22a   :  { %v698_v24 = vpop.f32.mrb[22].mxu1  ;;  %1641 = vmatprep.subr.bf16.mxu0 %v1640_v20  ;;  %v796_v30 = vmax.f32 %v695_v23, 0.0  ;;  %v539_v20 = vpop.permute.xlu0 %538 }
 0x22b   :  { %v699_v25 = vadd.f32 %v698_v24, %v504_v22  ;;  %v700_v26 = vpop.f32.mrb[23].mxu1  ;;  %1643 = vmatpush1.bf16.msra.mxu0 %v1642_v17  ;;  %v544_v23 = vpop.permute.xlu1 %543 }
 0x22c   :  { %v701_v27 = vadd.f32 %v700_v26, %v504_v22 }
 0x22d   :  { %v797_v29 = vmax.f32 %v699_v25, 0.0 }
 0x22e   :  { %v798_v31 = vmax.f32 %v701_v27, 0.0  ;;  %v704_v32 = vpop.f32.mrb[24].mxu1 }
 0x22f   :  { %v1646_v33 = vpack.c.bf16 %v797_v29, %v795_v28  ;;  %v706_v34 = vpop.f32.mrb[25].mxu1  ;;  %v705_v37 = vadd.f32 %v704_v32, %v509_v35 }
 0x230   :  { %v1644_v36 = vpack.c.bf16 %v798_v31, %v796_v30  ;;  %v707_v39 = vadd.f32 %v706_v34, %v509_v35 }
 0x231   :  { %v799_v44 = vmax.f32 %v705_v37, 0.0 }
 0x232   :  { %v710_v40 = vpop.f32.mrb[26].mxu1  ;;  %1645 = vmatprep.subr.bf16.mxu0 %v1644_v36  ;;  %v800_v46 = vmax.f32 %v707_v39, 0.0  ;;  %v549_v36 = vpop.permute.xlu0 %548 }
 0x233   :  { %v711_v41 = vadd.f32 %v710_v40, %v514_v38  ;;  %v712_v42 = vpop.f32.mrb[27].mxu1  ;;  %1647 = vmatpush1.bf16.msra.mxu0 %v1646_v33  ;;  %v554_v39 = vpop.permute.xlu1 %553 }
 0x234   :  { %v713_v43 = vadd.f32 %v712_v42, %v514_v38 }
 0x235   :  { %v801_v45 = vmax.f32 %v711_v41, 0.0 }
 0x236   :  { %v802_v47 = vmax.f32 %v713_v43, 0.0  ;;  %v716_v48 = vpop.f32.mrb[28].mxu1 }
 0x237   :  { %v1650_v49 = vpack.c.bf16 %v801_v45, %v799_v44  ;;  %v718_v50 = vpop.f32.mrb[29].mxu1  ;;  %v717_v53 = vadd.f32 %v716_v48, %v519_v51 }
 0x238   :  { %v1648_v52 = vpack.c.bf16 %v802_v47, %v800_v46  ;;  %v719_v55 = vadd.f32 %v718_v50, %v519_v51 }
 0x239   :  { %v803_v60 = vmax.f32 %v717_v53, 0.0 }
 0x23a   :  { %v722_v56 = vpop.f32.mrb[30].mxu1  ;;  %1649 = vmatprep.subr.bf16.mxu0 %v1648_v52  ;;  %v804_v62 = vmax.f32 %v719_v55, 0.0  ;;  %v559_v52 = vpop.permute.xlu0 %558 }
 0x23b   :  { %v723_v57 = vadd.f32 %v722_v56, %v524_v54  ;;  %v724_v58 = vpop.f32.mrb[31].mxu1  ;;  %1651 = vmatpush1.bf16.msra.mxu0 %v1650_v49  ;;  %v564_v55 = vpop.permute.xlu1 %563 }
 0x23c   :  { %v725_v59 = vadd.f32 %v724_v58, %v524_v54 }
 0x23d   :  { %v805_v61 = vmax.f32 %v723_v57, 0.0 }
 0x23e   :  { %v806_v63 = vmax.f32 %v725_v59, 0.0  ;;  %v728_v0 = vpop.f32.mrb[32].mxu1 }
 0x23f   :  { %v1654_v1 = vpack.c.bf16 %v805_v61, %v803_v60  ;;  %v730_v2 = vpop.f32.mrb[33].mxu1  ;;  %v729_v5 = vadd.f32 %v728_v0, %v529_v3 }
 0x240   :  { %v1652_v4 = vpack.c.bf16 %v806_v63, %v804_v62  ;;  %v731_v7 = vadd.f32 %v730_v2, %v529_v3  ;;  %v823_v3 = vld [vmem:[%s2403_s4] sm:$0xff] }
 0x241   :  { %v807_v13 = vmax.f32 %v729_v5, 0.0  ;;  %v825_v5 = vld [vmem:[%s2403_s4 + $0x10] sm:$0xff] }
 0x242   :  { %v734_v9 = vpop.f32.mrb[34].mxu1  ;;  %1653 = vmatprep.subr.bf16.mxu0 %v1652_v4  ;;  %v808_v15 = vmax.f32 %v731_v7, 0.0  ;;  %v826_v4 = vld [vmem:[%s2403_s4 + $0x18] sm:$0xff] }
 0x243   :  { %v735_v10 = vadd.f32 %v734_v9, %v534_v6  ;;  %v736_v11 = vpop.f32.mrb[35].mxu1  ;;  %1655 = vmatpush1.bf16.msra.mxu0 %v1654_v1 }
 0x244   :  { %v737_v12 = vadd.f32 %v736_v11, %v534_v6  ;;  %v832_v6 = vpop.permute.xlu1 %831 }
 0x245   :  { %v809_v14 = vmax.f32 %v735_v10, 0.0 }
 0x246   :  { %v810_v16 = vmax.f32 %v737_v12, 0.0  ;;  %v740_v17 = vpop.f32.mrb[36].mxu1  ;;  %v837_v12 = vpop.permute.xlu0 %836 }
 0x247   :  { %v1658_v18 = vpack.c.bf16 %v809_v14, %v807_v13  ;;  %v742_v19 = vpop.f32.mrb[37].mxu1  ;;  %v741_v22 = vadd.f32 %v740_v17, %v539_v20 }
 0x248   :  { %v1656_v21 = vpack.c.bf16 %v810_v16, %v808_v15  ;;  %v743_v24 = vadd.f32 %v742_v19, %v539_v20 }
 0x249   :  { %v811_v29 = vmax.f32 %v741_v22, 0.0  ;;  %v924_v22 = vld [vmem:[%s2405_s1 + $0x8] sm:$0xff] }
 0x24a   :  { %v746_v25 = vpop.f32.mrb[38].mxu1  ;;  %1657 = vmatprep.subr.bf16.mxu0 %v1656_v21  ;;  %v812_v31 = vmax.f32 %v743_v24, 0.0  ;;  %v923_v21 = vld [vmem:[%s2405_s1] sm:$0xff] }
 0x24b   :  { %v747_v26 = vadd.f32 %v746_v25, %v544_v23  ;;  %v748_v27 = vpop.f32.mrb[39].mxu1  ;;  %1659 = vmatpush1.bf16.msra.mxu0 %v1658_v18 }
 0x24c   :  { %v749_v28 = vadd.f32 %v748_v27, %v544_v23 }
 0x24d   :  { %v813_v30 = vmax.f32 %v747_v26, 0.0 }
 0x24e   :  { %v814_v32 = vmax.f32 %v749_v28, 0.0  ;;  %v752_v33 = vpop.f32.mrb[40].mxu1 }
 0x24f   :  { %v1662_v34 = vpack.c.bf16 %v813_v30, %v811_v29  ;;  %v754_v35 = vpop.f32.mrb[41].mxu1  ;;  %v753_v38 = vadd.f32 %v752_v33, %v549_v36  ;;  %v935_v29 = vld [vmem:[%s2407_s5] sm:$0xff]  ;;  %v936_v30 = vld [vmem:[%s2407_s5 + $0x8] sm:$0xff] }
 0x250   :  { %v1660_v37 = vpack.c.bf16 %v814_v32, %v812_v31  ;;  %v755_v40 = vadd.f32 %v754_v35, %v549_v36  ;;  %v937_v31 = vld [vmem:[%s2407_s5 + $0x10] sm:$0xff]  ;;  %v938_v32 = vld [vmem:[%s2407_s5 + $0x18] sm:$0xff]  ;;  %v939_v33 = vld [vmem:[%s2407_s5 + $0x20] sm:$0xff] }
 0x251   :  { %v815_v45 = vmax.f32 %v753_v38, 0.0  ;;  %v941_v35 = vld [vmem:[%s2407_s5 + $0x30] sm:$0xff]  ;;  %v942_v36 = vld [vmem:[%s2407_s5 + $0x38] sm:$0xff]  ;;  %v944_v38 = vld [vmem:[%s2407_s5 + $0x48] sm:$0xff] }
 0x252   :  { %v758_v41 = vpop.f32.mrb[42].mxu1  ;;  %1661 = vmatprep.subr.bf16.mxu0 %v1660_v37  ;;  %v816_v47 = vmax.f32 %v755_v40, 0.0  ;;  %v943_v37 = vld [vmem:[%s2407_s5 + $0x40] sm:$0xff]  ;;  %v946_v40 = vld [vmem:[%s2407_s5 + $0x58] sm:$0xff] }
 0x253   :  { %v759_v42 = vadd.f32 %v758_v41, %v554_v39  ;;  %v760_v43 = vpop.f32.mrb[43].mxu1  ;;  %1663 = vmatpush1.bf16.msra.mxu0 %v1662_v34  ;;  %v940_v34 = vld [vmem:[%s2407_s5 + $0x28] sm:$0xff]  ;;  %v947_v41 = vld [vmem:[%s2407_s5 + $0x60] sm:$0xff] }
 0x254   :  { %v761_v44 = vadd.f32 %v760_v43, %v554_v39  ;;  %v945_v39 = vld [vmem:[%s2407_s5 + $0x50] sm:$0xff] }
 0x255   :  { %v817_v46 = vmax.f32 %v759_v42, 0.0  ;;  %v948_v42 = vld [vmem:[%s2407_s5 + $0x68] sm:$0xff]  ;;  %v949_v43 = vld [vmem:[%s2407_s5 + $0x70] sm:$0xff] }
 0x256   :  { %v818_v48 = vmax.f32 %v761_v44, 0.0  ;;  %v764_v49 = vpop.f32.mrb[44].mxu1  ;;  %v950_v44 = vld [vmem:[%s2407_s5 + $0x78] sm:$0xff] }
 0x257   :  { %v1666_v50 = vpack.c.bf16 %v817_v46, %v815_v45  ;;  %v766_v51 = vpop.f32.mrb[45].mxu1  ;;  %v765_v54 = vadd.f32 %v764_v49, %v559_v52  ;;  %v975_v49 = vpop.permute.xlu1 %974 }
 0x258   :  { %v1664_v53 = vpack.c.bf16 %v818_v48, %v816_v47  ;;  %v767_v56 = vadd.f32 %v766_v51, %v559_v52  ;;  %v970_v47 = vpop.permute.xlu0 %969 }
 0x259   :  { %v819_v61 = vmax.f32 %v765_v54, 0.0 }
 0x25a   :  { %v770_v57 = vpop.f32.mrb[46].mxu1  ;;  %1665 = vmatprep.subr.bf16.mxu0 %v1664_v53  ;;  %v820_v63 = vmax.f32 %v767_v56, 0.0 }
 0x25b   :  { %v771_v58 = vadd.f32 %v770_v57, %v564_v55  ;;  %v772_v59 = vpop.f32.mrb[47].mxu1  ;;  %1667 = vmatpush1.bf16.msra.mxu0 %v1666_v50 }
 0x25c   :  { %v773_v60 = vadd.f32 %v772_v59, %v564_v55 }
 0x25d   :  { %v821_v62 = vmax.f32 %v771_v58, 0.0 }
 0x25e   :  { %v822_v0 = vmax.f32 %v773_v60, 0.0 }
 0x25f   :  { %v1670_v1 = vpack.c.bf16 %v821_v62, %v819_v61  ;;  %v980_v62 = vpop.permute.xlu0 %979 }
 0x260   :  { %v1668_v2 = vpack.c.bf16 %v822_v0, %v820_v63 }
 0x262   :  { %1669 = vmatprep.subr.bf16.mxu0 %v1668_v2 }
 0x263   :  { %1671 = vmatpush1.bf16.msra.mxu0 %v1670_v1  ;;  %v985_v1 = vpop.permute.xlu1 %984 }
 0x266   :  { %911 = vmatmul.mubr.f32.vlgmr.msra.gmra.mrb[32].mxu0 %v823_v3 }
 0x267   :  { %1551 = vmatprep.mubr.msk.f32.mxu0 %vm839_vm1, %v826_v4 }
 0x26a   :  { %917 = vmatmul.mubr.f32.gmra.mrb[34].mxu0 %v825_v5 }
 0x26b   :  { %1160 = vmatprep.mubr.f32.mxu0 %v1761_v8 }
 0x339   :  { %v912_v7 = vpop.f32.mrb[32].mxu0 }
 0x33a   :  { %v913_v9 = vadd.f32 %v912_v7, %v832_v6  ;;  %v914_v10 = vpop.f32.mrb[33].mxu0 }
 0x33b   :  { %v915_v11 = vadd.f32 %v914_v10, %v832_v6 }
 0x33c   :  { %1434 = vst [vmem:[%s2404_s10] sm:$0xff] %v913_v9 }
 0x33d   :  { %1435 = vst [vmem:[%s2404_s10 + $0x8] sm:$0xff] %v915_v11  ;;  %v918_v13 = vpop.f32.mrb[34].mxu0 }
 0x33e   :  { %v919_v14 = vadd.f32 %v918_v13, %v837_v12  ;;  %v920_v15 = vpop.f32.mrb[35].mxu0 }
 0x33f   :  { %v921_v16 = vadd.f32 %v920_v15, %v837_v12  ;;  %v990_v15 = vpop.permute.xlu0 %989 }
 0x340   :  { %v925_v17 = vmul.f32 0.5, %v919_v14  ;;  %1436 = vst [vmem:[%s2404_s10 + $0x10] sm:$0xff] %v919_v14 }
 0x341   :  { %v926_v18 = vmul.f32 0.5, %v921_v16  ;;  %1437 = vst [vmem:[%s2404_s10 + $0x18] sm:$0xff] %v921_v16 }
 0x342   :  { %v927_v19 = vmul.f32 1.442695, %v925_v17 }
 0x343   :  { %v929_v20 = vmul.f32 1.442695, %v926_v18  ;;  %v995_v18 = vpop.permute.xlu1 %994 }
 0x344   :  { %1708 = vpow2.f32 %v927_v19 }
 0x345   :  { %1710 = vpow2.f32 %v929_v20 }
 0x34e   :  { %v1709_v23 = vpop.eup %1708 }
 0x34f   :  { %v1711_v24 = vpop.eup %1710  ;;  %v931_v25 = vmul.f32 %v1709_v23, %v923_v21 }
 0x350   :  { %v932_v26 = vmul.f32 %v1711_v24, %v924_v22 }
 0x351   :  { %v933_v27 = vadd.f32 %v931_v25, %v913_v9 }
 0x352   :  { %v934_v28 = vadd.f32 %v932_v26, %v915_v11 }
 0x353   :  { %1432 = vst [vmem:[%s2406_s8] sm:$0xff] %v933_v27 }
 0x354   :  { %1096 = vmatprep.subr.mxu0 %v934_v28  ;;  %1433 = vst [vmem:[%s2406_s8 + $0x8] sm:$0xff] %v934_v28 }
 0x355   :  { %1097 = vmatpush1.msra.mxu0 %v933_v27 }
 0x356   :  { %1552 = vmatmul.mubr.msk.f32.vlgmr.msra.gmra.mrb[36].mxu0 %vm1047_vm2, %v935_v29 }
 0x357   :  { %1166 = vmatprep.mubr.f32.mxu0 %v1761_v8 }
 0x35a   :  { %1553 = vmatmul.mubr.msk.f32.gmra.mrb[38].mxu0 %vm1047_vm2, %v936_v30 }
 0x35b   :  { %1172 = vmatprep.mubr.f32.mxu0 %v1761_v8 }
 0x35e   :  { %1554 = vmatmul.mubr.msk.f32.gmra.mrb[40].mxu0 %vm1047_vm2, %v937_v31  ;;  %v1000_v31 = vpop.permute.xlu0 %999 }
 0x35f   :  { %1178 = vmatprep.mubr.f32.mxu0 %v1761_v8 }
 0x362   :  { %1555 = vmatmul.mubr.msk.f32.gmra.mrb[42].mxu0 %vm1047_vm2, %v938_v32 }
 0x363   :  { %1184 = vmatprep.mubr.f32.mxu0 %v1761_v8 }
 0x366   :  { %1556 = vmatmul.mubr.msk.f32.gmra.mrb[44].mxu0 %vm1047_vm2, %v939_v33 }
 0x367   :  { %1190 = vmatprep.mubr.f32.mxu0 %v1761_v8 }
 0x36a   :  { %1557 = vmatmul.mubr.msk.f32.gmra.mrb[46].mxu0 %vm1047_vm2, %v940_v34  ;;  %v1005_v34 = vpop.permute.xlu1 %1004 }
 0x36b   :  { %1196 = vmatprep.mubr.f32.mxu0 %v1761_v8 }
 0x36e   :  { %1558 = vmatmul.mubr.msk.f32.gmra.mrb[48].mxu0 %vm1047_vm2, %v941_v35 }
 0x36f   :  { %1202 = vmatprep.mubr.f32.mxu0 %v1761_v8 }
 0x372   :  { %1559 = vmatmul.mubr.msk.f32.gmra.mrb[50].mxu0 %vm1047_vm2, %v942_v36 }
 0x373   :  { %1208 = vmatprep.mubr.f32.mxu0 %v1761_v8 }
 0x376   :  { %1560 = vmatmul.mubr.msk.f32.gmra.mrb[52].mxu0 %vm1047_vm2, %v943_v37 }
 0x377   :  { %1214 = vmatprep.mubr.f32.mxu0 %v1761_v8 }
 0x37a   :  { %1561 = vmatmul.mubr.msk.f32.gmra.mrb[54].mxu0 %vm1047_vm2, %v944_v38 }
 0x37b   :  { %1220 = vmatprep.mubr.f32.mxu0 %v1761_v8 }
 0x37e   :  { %1562 = vmatmul.mubr.msk.f32.gmra.mrb[56].mxu0 %vm1047_vm2, %v945_v39 }
 0x37f   :  { %1226 = vmatprep.mubr.f32.mxu0 %v1761_v8 }
 0x382   :  { %1563 = vmatmul.mubr.msk.f32.gmra.mrb[58].mxu0 %vm1047_vm2, %v946_v40 }
 0x383   :  { %1232 = vmatprep.mubr.f32.mxu0 %v1761_v8 }
 0x386   :  { %1564 = vmatmul.mubr.msk.f32.gmra.mrb[60].mxu0 %vm1047_vm2, %v947_v41 }
 0x387   :  { %1238 = vmatprep.mubr.f32.mxu0 %v1761_v8 }
 0x38a   :  { %1565 = vmatmul.mubr.msk.f32.gmra.mrb[62].mxu0 %vm1047_vm2, %v948_v42 }
 0x38b   :  { %1244 = vmatprep.mubr.f32.mxu0 %v1761_v8 }
 0x38e   :  { %1566 = vmatmul.mubr.msk.f32.gmra.mrb[64].mxu0 %vm1047_vm2, %v949_v43 }
 0x38f   :  { %1250 = vmatprep.mubr.f32.mxu0 %v1761_v8 }
 0x392   :  { %1567 = vmatmul.mubr.msk.f32.gmra.mrb[66].mxu0 %vm1047_vm2, %v950_v44 }
 0x429   :  { %v1162_v45 = vpop.f32.mrb[36].mxu0 }
 0x42a   :  { %v1164_v46 = vpop.f32.mrb[37].mxu0  ;;  %v1163_v48 = vadd.f32 %v1162_v45, %v970_v47 }
 0x42b   :  { %v1165_v50 = vadd.f32 %v1164_v46, %v970_v47  ;;  %v1010_v47 = vpop.permute.xlu0 %1009 }
 0x42c   :  { %v1257_v55 = vmax.f32 %v1163_v48, 0.0 }
 0x42d   :  { %v1168_v51 = vpop.f32.mrb[38].mxu0  ;;  %v1258_v57 = vmax.f32 %v1165_v50, 0.0  ;;  %v1015_v50 = vpop.permute.xlu1 %1014 }
 0x42e   :  { %v1169_v52 = vadd.f32 %v1168_v51, %v975_v49  ;;  %v1170_v53 = vpop.f32.mrb[39].mxu0 }
 0x42f   :  { %v1171_v54 = vadd.f32 %v1170_v53, %v975_v49 }
 0x430   :  { %v1259_v56 = vmax.f32 %v1169_v52, 0.0 }
 0x431   :  { %v1260_v58 = vmax.f32 %v1171_v54, 0.0  ;;  %v1174_v59 = vpop.f32.mrb[40].mxu0 }
 0x432   :  { %v1674_v60 = vpack.c.bf16 %v1259_v56, %v1257_v55  ;;  %v1176_v61 = vpop.f32.mrb[41].mxu0  ;;  %v1175_v0 = vadd.f32 %v1174_v59, %v980_v62 }
 0x433   :  { %v1672_v63 = vpack.c.bf16 %v1260_v58, %v1258_v57  ;;  %v1177_v2 = vadd.f32 %v1176_v61, %v980_v62 }
 0x434   :  { %v1261_v7 = vmax.f32 %v1175_v0, 0.0 }
 0x435   :  { %v1180_v3 = vpop.f32.mrb[42].mxu0  ;;  %1673 = vmatprep.subr.bf16.mxu1 %v1672_v63  ;;  %v1262_v10 = vmax.f32 %v1177_v2, 0.0  ;;  %v1020_v63 = vpop.permute.xlu0 %1019 }
 0x436   :  { %v1181_v4 = vadd.f32 %v1180_v3, %v985_v1  ;;  %v1182_v5 = vpop.f32.mrb[43].mxu0  ;;  %1675 = vmatpush1.bf16.msra.mxu1 %v1674_v60  ;;  %v1025_v2 = vpop.permute.xlu1 %1024 }
 0x437   :  { %v1183_v6 = vadd.f32 %v1182_v5, %v985_v1 }
 0x438   :  { %v1263_v9 = vmax.f32 %v1181_v4, 0.0 }
 0x439   :  { %v1264_v11 = vmax.f32 %v1183_v6, 0.0  ;;  %v1186_v12 = vpop.f32.mrb[44].mxu0 }
 0x43a   :  { %v1678_v13 = vpack.c.bf16 %v1263_v9, %v1261_v7  ;;  %v1188_v14 = vpop.f32.mrb[45].mxu0  ;;  %v1187_v17 = vadd.f32 %v1186_v12, %v990_v15 }
 0x43b   :  { %v1676_v16 = vpack.c.bf16 %v1264_v11, %v1262_v10  ;;  %v1189_v19 = vadd.f32 %v1188_v14, %v990_v15 }
 0x43c   :  { %v1265_v24 = vmax.f32 %v1187_v17, 0.0 }
 0x43d   :  { %v1192_v20 = vpop.f32.mrb[46].mxu0  ;;  %1677 = vmatprep.subr.bf16.mxu1 %v1676_v16  ;;  %v1266_v26 = vmax.f32 %v1189_v19, 0.0  ;;  %v1030_v16 = vpop.permute.xlu0 %1029 }
 0x43e   :  { %v1193_v21 = vadd.f32 %v1192_v20, %v995_v18  ;;  %v1194_v22 = vpop.f32.mrb[47].mxu0  ;;  %1679 = vmatpush1.bf16.msra.mxu1 %v1678_v13  ;;  %v1035_v19 = vpop.permute.xlu1 %1034 }
 0x43f   :  { %v1195_v23 = vadd.f32 %v1194_v22, %v995_v18 }
 0x440   :  { %v1267_v25 = vmax.f32 %v1193_v21, 0.0 }
 0x441   :  { %v1268_v27 = vmax.f32 %v1195_v23, 0.0  ;;  %v1198_v28 = vpop.f32.mrb[48].mxu0 }
 0x442   :  { %v1682_v29 = vpack.c.bf16 %v1267_v25, %v1265_v24  ;;  %v1200_v30 = vpop.f32.mrb[49].mxu0  ;;  %v1199_v33 = vadd.f32 %v1198_v28, %v1000_v31 }
 0x443   :  { %v1680_v32 = vpack.c.bf16 %v1268_v27, %v1266_v26  ;;  %v1201_v35 = vadd.f32 %v1200_v30, %v1000_v31 }
 0x444   :  { %v1269_v40 = vmax.f32 %v1199_v33, 0.0 }
 0x445   :  { %v1204_v36 = vpop.f32.mrb[50].mxu0  ;;  %1681 = vmatprep.subr.bf16.mxu1 %v1680_v32  ;;  %v1270_v42 = vmax.f32 %v1201_v35, 0.0  ;;  %v1040_v32 = vpop.permute.xlu0 %1039 }
 0x446   :  { %v1205_v37 = vadd.f32 %v1204_v36, %v1005_v34  ;;  %v1206_v38 = vpop.f32.mrb[51].mxu0  ;;  %1683 = vmatpush1.bf16.msra.mxu1 %v1682_v29  ;;  %v1045_v35 = vpop.permute.xlu1 %1044 }
 0x447   :  { %v1207_v39 = vadd.f32 %v1206_v38, %v1005_v34 }
 0x448   :  { %v1271_v41 = vmax.f32 %v1205_v37, 0.0 }
 0x449   :  { %v1272_v43 = vmax.f32 %v1207_v39, 0.0  ;;  %v1210_v44 = vpop.f32.mrb[52].mxu0 }
 0x44a   :  { %v1686_v45 = vpack.c.bf16 %v1271_v41, %v1269_v40  ;;  %v1212_v46 = vpop.f32.mrb[53].mxu0  ;;  %v1211_v49 = vadd.f32 %v1210_v44, %v1010_v47 }
 0x44b   :  { %v1684_v48 = vpack.c.bf16 %v1272_v43, %v1270_v42  ;;  %v1213_v51 = vadd.f32 %v1212_v46, %v1010_v47  ;;  %v1289_v47 = vld [vmem:[%s2408_s6] sm:$0xff] }
 0x44c   :  { %v1273_v56 = vmax.f32 %v1211_v49, 0.0  ;;  %v1291_v49 = vld [vmem:[%s2408_s6 + $0x10] sm:$0xff] }
 0x44d   :  { %v1216_v52 = vpop.f32.mrb[54].mxu0  ;;  %1685 = vmatprep.subr.bf16.mxu1 %v1684_v48  ;;  %v1274_v58 = vmax.f32 %v1213_v51, 0.0  ;;  %v1290_v48 = vld [vmem:[%s2408_s6 + $0x8] sm:$0xff]  ;;  %v1293_v51 = vld [vmem:[%s2408_s6 + $0x20] sm:$0xff] }
 0x44e   :  { %v1217_v53 = vadd.f32 %v1216_v52, %v1015_v50  ;;  %v1218_v54 = vpop.f32.mrb[55].mxu0  ;;  %1687 = vmatpush1.bf16.msra.mxu1 %v1686_v45  ;;  %v1294_v52 = vld [vmem:[%s2408_s6 + $0x28] sm:$0xff] }
 0x44f   :  { %v1219_v55 = vadd.f32 %v1218_v54, %v1015_v50  ;;  %v1292_v50 = vld [vmem:[%s2408_s6 + $0x18] sm:$0xff] }
 0x450   :  { %v1275_v57 = vmax.f32 %v1217_v53, 0.0  ;;  %v1304_v53 = vpop.permute.xlu0 %1303 }
 0x451   :  { %v1276_v59 = vmax.f32 %v1219_v55, 0.0  ;;  %v1222_v60 = vpop.f32.mrb[56].mxu0 }
 0x452   :  { %v1690_v61 = vpack.c.bf16 %v1275_v57, %v1273_v56  ;;  %v1224_v62 = vpop.f32.mrb[57].mxu0  ;;  %v1223_v1 = vadd.f32 %v1222_v60, %v1020_v63 }
 0x453   :  { %v1688_v0 = vpack.c.bf16 %v1276_v59, %v1274_v58  ;;  %v1225_v3 = vadd.f32 %v1224_v62, %v1020_v63  ;;  %v1309_v59 = vpop.permute.xlu1 %1308 }
 0x454   :  { %v1277_v9 = vmax.f32 %v1223_v1, 0.0  ;;  %v1314_v1 = vpop.permute.xlu0 %1313 }
 0x455   :  { %v1228_v4 = vpop.f32.mrb[58].mxu0  ;;  %1689 = vmatprep.subr.bf16.mxu1 %v1688_v0  ;;  %v1278_v11 = vmax.f32 %v1225_v3, 0.0 }
 0x456   :  { %v1229_v5 = vadd.f32 %v1228_v4, %v1025_v2  ;;  %v1230_v6 = vpop.f32.mrb[59].mxu0  ;;  %1691 = vmatpush1.bf16.msra.mxu1 %v1690_v61 }
 0x457   :  { %v1231_v7 = vadd.f32 %v1230_v6, %v1025_v2 }
 0x458   :  { %v1279_v10 = vmax.f32 %v1229_v5, 0.0 }
 0x459   :  { %v1280_v12 = vmax.f32 %v1231_v7, 0.0  ;;  %v1234_v13 = vpop.f32.mrb[60].mxu0 }
 0x45a   :  { %v1694_v14 = vpack.c.bf16 %v1279_v10, %v1277_v9  ;;  %v1236_v15 = vpop.f32.mrb[61].mxu0  ;;  %v1235_v18 = vadd.f32 %v1234_v13, %v1030_v16  ;;  %v1319_v9 = vpop.permute.xlu1 %1318 }
 0x45b   :  { %v1692_v17 = vpack.c.bf16 %v1280_v12, %v1278_v11  ;;  %v1237_v20 = vadd.f32 %v1236_v15, %v1030_v16 }
 0x45c   :  { %v1281_v25 = vmax.f32 %v1235_v18, 0.0  ;;  %v1324_v18 = vpop.permute.xlu0 %1323 }
 0x45d   :  { %v1240_v21 = vpop.f32.mrb[62].mxu0  ;;  %1693 = vmatprep.subr.bf16.mxu1 %v1692_v17  ;;  %v1282_v27 = vmax.f32 %v1237_v20, 0.0 }
 0x45e   :  { %v1241_v22 = vadd.f32 %v1240_v21, %v1035_v19  ;;  %v1242_v23 = vpop.f32.mrb[63].mxu0  ;;  %1695 = vmatpush1.bf16.msra.mxu1 %v1694_v14 }
 0x45f   :  { %v1243_v24 = vadd.f32 %v1242_v23, %v1035_v19 }
 0x460   :  { %v1283_v26 = vmax.f32 %v1241_v22, 0.0 }
 0x461   :  { %v1284_v28 = vmax.f32 %v1243_v24, 0.0  ;;  %v1246_v29 = vpop.f32.mrb[64].mxu0 }
 0x462   :  { %v1698_v30 = vpack.c.bf16 %v1283_v26, %v1281_v25  ;;  %v1248_v31 = vpop.f32.mrb[65].mxu0  ;;  %v1247_v34 = vadd.f32 %v1246_v29, %v1040_v32  ;;  %v1329_v29 = vpop.permute.xlu1 %1328 }
 0x463   :  { %v1696_v33 = vpack.c.bf16 %v1284_v28, %v1282_v27  ;;  %v1249_v36 = vadd.f32 %v1248_v31, %v1040_v32 }
 0x464   :  { %v1285_v41 = vmax.f32 %v1247_v34, 0.0 }
 0x465   :  { %v1252_v37 = vpop.f32.mrb[66].mxu0  ;;  %1697 = vmatprep.subr.bf16.mxu1 %v1696_v33  ;;  %v1286_v43 = vmax.f32 %v1249_v36, 0.0 }
 0x466   :  { %v1253_v38 = vadd.f32 %v1252_v37, %v1045_v35  ;;  %v1254_v39 = vpop.f32.mrb[67].mxu0  ;;  %1699 = vmatpush1.bf16.msra.mxu1 %v1698_v30 }
 0x467   :  { %v1255_v40 = vadd.f32 %v1254_v39, %v1045_v35 }
 0x468   :  { %v1287_v42 = vmax.f32 %v1253_v38, 0.0 }
 0x469   :  { %v1288_v44 = vmax.f32 %v1255_v40, 0.0 }
 0x46a   :  { %v1702_v45 = vpack.c.bf16 %v1287_v42, %v1285_v41 }
 0x46b   :  { %v1700_v46 = vpack.c.bf16 %v1288_v44, %v1286_v43 }
 0x46d   :  { %1701 = vmatprep.subr.bf16.mxu1 %v1700_v46 }
 0x46e   :  { %1703 = vmatpush1.bf16.msra.mxu1 %v1702_v45 }
 0x471   :  { %1396 = vmatmul.mubr.f32.vlgmr.msra.gmra.mrb[48].mxu1 %v1289_v47 }
 0x472   :  { %1401 = vmatprep.mubr.f32.mxu1 %v1761_v8 }
 0x475   :  { %1402 = vmatmul.mubr.f32.gmra.mrb[50].mxu1 %v1290_v48 }
 0x476   :  { %1407 = vmatprep.mubr.f32.mxu1 %v1761_v8 }
 0x479   :  { %1408 = vmatmul.mubr.f32.gmra.mrb[52].mxu1 %v1291_v49 }
 0x47a   :  { %1413 = vmatprep.mubr.f32.mxu1 %v1761_v8 }
 0x47d   :  { %1414 = vmatmul.mubr.f32.gmra.mrb[54].mxu1 %v1292_v50 }
 0x47e   :  { %1419 = vmatprep.mubr.f32.mxu1 %v1761_v8 }
 0x481   :  { %1420 = vmatmul.mubr.f32.gmra.mrb[56].mxu1 %v1293_v51 }
 0x482   :  { %1425 = vmatprep.mubr.f32.mxu1 %v1761_v8 }
 0x485   :  { %1426 = vmatmul.mubr.f32.gmra.mrb[58].mxu1 %v1294_v52 }
 0x544   :  { %v1397_v54 = vpop.f32.mrb[48].mxu1 }
 0x545   :  { %v1398_v55 = vadd.f32 %v1397_v54, %v1304_v53  ;;  %v1399_v56 = vpop.f32.mrb[49].mxu1 }
 0x546   :  { %v1400_v57 = vadd.f32 %v1399_v56, %v1304_v53 }
 0x547   :  { %v1568_v58 = vmul.f32 -1.442695, %v1398_v55 }
 0x548   :  { %v1569_v60 = vmul.f32 -1.442695, %v1400_v57  ;;  %v1403_v61 = vpop.f32.mrb[50].mxu1 }
 0x549   :  { %1712 = vpow2.f32 %v1568_v58  ;;  %v1404_v62 = vadd.f32 %v1403_v61, %v1309_v59  ;;  %v1405_v63 = vpop.f32.mrb[51].mxu1 }
 0x54a   :  { %1714 = vpow2.f32 %v1569_v60  ;;  %v1406_v0 = vadd.f32 %v1405_v63, %v1309_v59 }
 0x54b   :  { %v1570_v8 = vmul.f32 -1.442695, %v1404_v62 }
 0x54c   :  { %v1571_v2 = vmul.f32 -1.442695, %v1406_v0  ;;  %v1409_v3 = vpop.f32.mrb[52].mxu1 }
 0x54d   :  { %1716 = vpow2.f32 %v1570_v8  ;;  %v1410_v4 = vadd.f32 %v1409_v3, %v1314_v1  ;;  %v1411_v5 = vpop.f32.mrb[53].mxu1 }
 0x54e   :  { %1718 = vpow2.f32 %v1571_v2  ;;  %v1412_v6 = vadd.f32 %v1411_v5, %v1314_v1 }
 0x54f   :  { %v1572_v7 = vmul.f32 -1.442695, %v1410_v4 }
 0x550   :  { %v1573_v10 = vmul.f32 -1.442695, %v1412_v6  ;;  %v1415_v11 = vpop.f32.mrb[54].mxu1 }
 0x551   :  { %1720 = vpow2.f32 %v1572_v7  ;;  %v1416_v12 = vadd.f32 %v1415_v11, %v1319_v9  ;;  %v1417_v13 = vpop.f32.mrb[55].mxu1 }
 0x552   :  { %1722 = vpow2.f32 %v1573_v10  ;;  %v1418_v14 = vadd.f32 %v1417_v13, %v1319_v9 }
 0x553   :  { %v1713_v15 = vpop.eup %1712  ;;  %v1574_v16 = vmul.f32 -1.442695, %v1416_v12 }
 0x554   :  { %v1715_v17 = vpop.eup %1714  ;;  %v1474_v19 = vadd.f32 1.0, %v1713_v15  ;;  %v1575_v20 = vmul.f32 -1.442695, %v1418_v14  ;;  %v1421_v21 = vpop.f32.mrb[56].mxu1 }
 0x555   :  { %v1475_v22 = vadd.f32 1.0, %v1715_v17  ;;  %1724 = vpow2.f32 %v1574_v16  ;;  %v1422_v23 = vadd.f32 %v1421_v21, %v1324_v18  ;;  %v1423_v24 = vpop.f32.mrb[57].mxu1 }
 0x556   :  { %1726 = vrcp.f32 %v1474_v19  ;;  %v1424_v25 = vadd.f32 %v1423_v24, %v1324_v18 }
 0x557   :  { %v1717_v26 = vpop.eup %1716  ;;  %1728 = vrcp.f32 %v1475_v22  ;;  %v1576_v27 = vmul.f32 -1.442695, %v1422_v23 }
 0x558   :  { %v1719_v28 = vpop.eup %1718  ;;  %v1476_v30 = vadd.f32 1.0, %v1717_v26  ;;  %1730 = vpow2.f32 %v1575_v20  ;;  %v1577_v31 = vmul.f32 -1.442695, %v1424_v25  ;;  %v1427_v32 = vpop.f32.mrb[58].mxu1 }
 0x559   :  { %v1477_v33 = vadd.f32 1.0, %v1719_v28  ;;  %1732 = vpow2.f32 %v1576_v27  ;;  %v1428_v34 = vadd.f32 %v1427_v32, %v1329_v29  ;;  %v1429_v35 = vpop.f32.mrb[59].mxu1 }
 0x55a   :  { %1734 = vrcp.f32 %v1476_v30  ;;  %v1430_v36 = vadd.f32 %v1429_v35, %v1329_v29 }
 0x55b   :  { %v1721_v37 = vpop.eup %1720  ;;  %1736 = vrcp.f32 %v1477_v33  ;;  %v1578_v38 = vmul.f32 -1.442695, %v1428_v34 }
 0x55c   :  { %v1723_v39 = vpop.eup %1722  ;;  %v1478_v40 = vadd.f32 1.0, %v1721_v37  ;;  %1738 = vpow2.f32 %v1577_v31  ;;  %v1579_v41 = vmul.f32 -1.442695, %v1430_v36 }
 0x55d   :  { %v1479_v42 = vadd.f32 1.0, %v1723_v39  ;;  %1740 = vpow2.f32 %v1578_v38 }
 0x55e   :  { %1742 = vrcp.f32 %v1478_v40 }
 0x55f   :  { %v1725_v43 = vpop.eup %1724  ;;  %1744 = vrcp.f32 %v1479_v42 }
 0x560   :  { %v1727_v44 = vpop.eup %1726  ;;  %v1480_v45 = vadd.f32 1.0, %v1725_v43  ;;  %1746 = vpow2.f32 %v1579_v41 }
 0x561   :  { %v1729_v46 = vpop.eup %1728  ;;  %1510 = vst [vmem:[%s2409_s9] sm:$0xff] %v1727_v44 }
 0x562   :  { %v1731_v47 = vpop.eup %1730  ;;  %1511 = vst [vmem:[%s2409_s9 + $0x8] sm:$0xff] %v1729_v46  ;;  %1748 = vrcp.f32 %v1480_v45 }
 0x563   :  { %v1733_v48 = vpop.eup %1732  ;;  %v1481_v49 = vadd.f32 1.0, %v1731_v47 }
 0x564   :  { %v1735_v50 = vpop.eup %1734  ;;  %v1482_v51 = vadd.f32 1.0, %v1733_v48 }
 0x565   :  { %v1737_v52 = vpop.eup %1736  ;;  %1512 = vst [vmem:[%s2409_s9 + $0x10] sm:$0xff] %v1735_v50  ;;  %1750 = vrcp.f32 %v1481_v49 }
 0x566   :  { %v1739_v53 = vpop.eup %1738  ;;  %1513 = vst [vmem:[%s2409_s9 + $0x18] sm:$0xff] %v1737_v52  ;;  %1752 = vrcp.f32 %v1482_v51 }
 0x567   :  { %v1741_v54 = vpop.eup %1740  ;;  %v1483_v55 = vadd.f32 1.0, %v1739_v53 }
 0x568   :  { %v1743_v56 = vpop.eup %1742  ;;  %v1484_v57 = vadd.f32 1.0, %v1741_v54 }
 0x569   :  { %v1745_v58 = vpop.eup %1744  ;;  %1514 = vst [vmem:[%s2409_s9 + $0x20] sm:$0xff] %v1743_v56  ;;  %1754 = vrcp.f32 %v1483_v55 }
 0x56a   :  { %v1747_v59 = vpop.eup %1746  ;;  %1515 = vst [vmem:[%s2409_s9 + $0x28] sm:$0xff] %v1745_v58  ;;  %1756 = vrcp.f32 %v1484_v57 }
 0x56b   :  { %v1485_v60 = vadd.f32 1.0, %v1747_v59 }
 0x56c   :  { %v1749_v61 = vpop.eup %1748 }
 0x56d   :  { %1516 = vst [vmem:[%s2409_s9 + $0x30] sm:$0xff] %v1749_v61  ;;  %1758 = vrcp.f32 %v1485_v60 }
 0x56f   :  { %v1751_v62 = vpop.eup %1750 }
 0x570   :  { %v1753_v63 = vpop.eup %1752  ;;  %1517 = vst [vmem:[%s2409_s9 + $0x38] sm:$0xff] %v1751_v62 }
 0x571   :  { %1518 = vst [vmem:[%s2409_s9 + $0x40] sm:$0xff] %v1753_v63 }
 0x573   :  { %v1755_v0 = vpop.eup %1754 }
 0x574   :  { %v1757_v8 = vpop.eup %1756  ;;  %1519 = vst [vmem:[%s2409_s9 + $0x48] sm:$0xff] %v1755_v0 }
 0x575   :  { %1520 = vst [vmem:[%s2409_s9 + $0x50] sm:$0xff] %v1757_v8 }
 0x577   :  { %v1759_v1 = vpop.eup %1758 }
 0x578   :  { %1521 = vst [vmem:[%s2409_s9 + $0x58] sm:$0xff] %v1759_v1 }

</bundles_post_ra>
